<compile_context>
chip_gen: v7x
topology: tpu7x:2x2x1
jax: 0.10.0
libtpu: 0.0.40
codegen_flags: <defaults>
</compile_context>

<pallas_src>
import jax
import jax.numpy as jnp
from jax.experimental import pallas as pl
from jax.experimental.pallas import tpu as pltpu


_LAYER_DIMS = [(256, 128), (128, 64), (64, 32), (32, 4)]


def _mlp_kernel(x_ref, w1_ref, b1_ref, w2_ref, b2_ref,
                w3_ref, b3_ref, w4_ref, b4_ref, o_ref):
    # Whole encoder fused: 4 matmuls (bf16 operands, f32 accumulation) + f32
    # bias add + f32 tanh. Intermediates are re-cast to bf16 for the next MXU op.
    h = jnp.tanh(
        jnp.dot(x_ref[...], w1_ref[...], preferred_element_type=jnp.float32)
        + b1_ref[...])
    h = jnp.tanh(
        jnp.dot(h.astype(jnp.bfloat16), w2_ref[...],
                preferred_element_type=jnp.float32) + b2_ref[...])
    h = jnp.tanh(
        jnp.dot(h.astype(jnp.bfloat16), w3_ref[...],
                preferred_element_type=jnp.float32) + b3_ref[...])
    out = jnp.tanh(
        jnp.dot(h.astype(jnp.bfloat16), w4_ref[...],
                preferred_element_type=jnp.float32) + b4_ref[...])
    # TODO(synk): if a bundle dump shows vst.msk on the critical path, pad the
    # last layer to 128 lanes and slice [:, :4] in the wrapper instead.
    o_ref[...] = out.astype(o_ref.dtype)


def _round_up(n, m):
    return ((n + m - 1) // m) * m


def linear_en1_forward(x, params, *, tb=None):
    """x: [B, 256] f32. params: dict with w1..w4 ([in,out]) and b1..b4 ([1,out])."""
    B, D_in = x.shape
    assert D_in == 256

    if tb is None:
        # Large batch tile amortizes the ~0.35us/step pipeline overhead and
        # fills the MXU; prefer >=2 grid steps so v7x's two TensorCores both
        # get work. Cap at 1024 rows (fits v7x's 32 MiB default scoped VMEM
        # with plenty of headroom: ~0.5 MiB bf16 x tile x2 buffers).
        tb = 8 if B <= 8 else min(1024, _round_up(pl.cdiv(B, 2), 8))
    tb = max(8, min(tb, _round_up(B, 8)))

    Bp = _round_up(B, tb)
    if Bp != B:
        x = jnp.pad(x, ((0, Bp - B), (0, 0)))

    # bf16 operands for the MXU; f32 accumulation / bias / tanh inside the kernel.
    x_bf = x.astype(jnp.bfloat16)
    w = [params[f"w{i}"].astype(jnp.bfloat16) for i in range(1, 5)]
    b = [params[f"b{i}"].astype(jnp.float32) for i in range(1, 5)]
    D_out = w[3].shape[1]

    # Weights/biases are tiny (<0.1 MiB total in bf16) -> full blocks, resident
    # in VMEM; only the batch dimension is tiled across the grid.
    def full(shape):
        return pl.BlockSpec(shape, lambda i: (0, 0))

    flops_per_row = 2 * sum(din * dout for din, dout in _LAYER_DIMS)
    trans_per_row = sum(dout for _, dout in _LAYER_DIMS)
    weight_bytes = sum(din * dout * 2 + dout * 4 for din, dout in _LAYER_DIMS)
    cost = pl.CostEstimate(
        flops=Bp * flops_per_row,
        transcendentals=Bp * trans_per_row,
        bytes_accessed=Bp * (D_in * 2 + D_out * 4) + weight_bytes)

    out = pl.pallas_call(
        _mlp_kernel,
        out_shape=jax.ShapeDtypeStruct((Bp, D_out), jnp.float32),
        grid_spec=pltpu.PrefetchScalarGridSpec(
            num_scalar_prefetch=0,
            grid=(Bp // tb,),
            in_specs=[
                pl.BlockSpec((tb, D_in), lambda i: (i, 0)),   # x tile
                full(w[0].shape), full(b[0].shape),
                full(w[1].shape), full(b[1].shape),
                full(w[2].shape), full(b[2].shape),
                full(w[3].shape), full(b[3].shape),
            ],
            out_specs=pl.BlockSpec((tb, D_out), lambda i: (i, 0)),
        ),
        compiler_params=pltpu.CompilerParams(
            dimension_semantics=("parallel",)),
        cost_estimate=cost,
    )(x_bf, w[0], b[0], w[1], b[1], w[2], b[2], w[3], b[3])

    return out[:B]


def init_params(key):
    """Deterministic synthetic parameters matching nn.Linear shapes.

    PyTorch nn.Linear(in,out) has W:[out,in], b:[out]; we store W transposed as
    [in,out] (f32 master copy) and b as [1,out]. Uses uniform(-1/sqrt(in),
    1/sqrt(in)) like torch's default init, seeded with JAX PRNG (synthetic).
    """
    params = {}
    for idx, (din, dout) in enumerate(_LAYER_DIMS, start=1):
        key, kw, kb = jax.random.split(key, 3)
        bound = 1.0 / jnp.sqrt(din)
        params[f"w{idx}"] = jax.random.uniform(
            kw, (din, dout), jnp.float32, minval=-bound, maxval=bound)
        params[f"b{idx}"] = jax.random.uniform(
            kb, (1, dout), jnp.float32, minval=-bound, maxval=bound)
    return params


def reference_forward(x, params, compute_dtype=None):
    """Pure-JAX reference. compute_dtype=bfloat16 mimics the kernel's MXU dtypes."""
    h = x
    for i in range(1, 5):
        w_i = params[f"w{i}"]
        b_i = params[f"b{i}"]
        if compute_dtype is not None:
            pre = jnp.dot(h.astype(compute_dtype), w_i.astype(compute_dtype),
                          preferred_element_type=jnp.float32) + b_i
        else:
            pre = h @ w_i + b_i
        h = jnp.tanh(pre)
    return h


if __name__ == "__main__":
    key = jax.random.PRNGKey(0)
    key, kx = jax.random.split(key)
    params = init_params(key)

    # Main test: batch large enough to exercise >=2 grid steps with the
    # default tile selection (B=512 -> tb=256, grid=2). Still small (~0.5 MiB).
    B = 512
    x = jax.random.normal(kx, (B, 256), jnp.float32)
    out = jax.block_until_ready(linear_en1_forward(x, params))
    assert out.shape == (B, 4), out.shape

    ref_bf16 = reference_forward(x, params, compute_dtype=jnp.bfloat16)
    ref_f32 = reference_forward(x, params)
    err_bf16 = float(jnp.max(jnp.abs(out - ref_bf16)))
    err_f32 = float(jnp.max(jnp.abs(out - ref_f32)))
    assert jnp.allclose(out, ref_bf16, atol=1e-4, rtol=0.0), err_bf16
    assert jnp.allclose(out, ref_f32, atol=5e-2, rtol=0.0), err_f32

    # Second test: non-multiple batch exercises the zero-pad + slice path.
    B2 = 200
    x2 = jax.random.normal(jax.random.PRNGKey(1), (B2, 256), jnp.float32)
    out2 = jax.block_until_ready(linear_en1_forward(x2, params))
    ref2 = reference_forward(x2, params, compute_dtype=jnp.bfloat16)
    assert out2.shape == (B2, 4), out2.shape
    assert jnp.allclose(out2, ref2, atol=1e-4, rtol=0.0), (
        float(jnp.max(jnp.abs(out2 - ref2))))

    print("KERNEL_OK")
</pallas_src>

<mosaic_0001>
module attributes {stable_mosaic.version = 11 : i64} {
  func.func @_mlp_kernel(%arg0: i32, %arg1: memref<256x256xbf16, #tpu.memory_space<vmem>>, %arg2: memref<256x128xbf16, #tpu.memory_space<vmem>>, %arg3: memref<1x128xf32, #tpu.memory_space<vmem>>, %arg4: memref<128x64xbf16, #tpu.memory_space<vmem>>, %arg5: memref<1x64xf32, #tpu.memory_space<vmem>>, %arg6: memref<64x32xbf16, #tpu.memory_space<vmem>>, %arg7: memref<1x32xf32, #tpu.memory_space<vmem>>, %arg8: memref<32x4xbf16, #tpu.memory_space<vmem>>, %arg9: memref<1x4xf32, #tpu.memory_space<vmem>>, %arg10: memref<256x4xf32, #tpu.memory_space<vmem>>) attributes {dimension_semantics = [#tpu.dimension_semantics<parallel>], iteration_bounds = array<i64: 2>, scalar_prefetch = 0 : i64, scratch_operands = 0 : i64, tpu.core_type = #tpu.core_type<tc>, window_params = [{transform_indices = @transform_0, window_bounds = array<i64: 256, 256>}, {pipeline_mode = #tpu.pipeline_mode<synchronous>, transform_indices = @transform_1, window_bounds = array<i64: 256, 128>}, {pipeline_mode = #tpu.pipeline_mode<synchronous>, transform_indices = @transform_2, window_bounds = array<i64: 1, 128>}, {pipeline_mode = #tpu.pipeline_mode<synchronous>, transform_indices = @transform_3, window_bounds = array<i64: 128, 64>}, {pipeline_mode = #tpu.pipeline_mode<synchronous>, transform_indices = @transform_4, window_bounds = array<i64: 1, 64>}, {pipeline_mode = #tpu.pipeline_mode<synchronous>, transform_indices = @transform_5, window_bounds = array<i64: 64, 32>}, {pipeline_mode = #tpu.pipeline_mode<synchronous>, transform_indices = @transform_6, window_bounds = array<i64: 1, 32>}, {pipeline_mode = #tpu.pipeline_mode<synchronous>, transform_indices = @transform_7, window_bounds = array<i64: 32, 4>}, {pipeline_mode = #tpu.pipeline_mode<synchronous>, transform_indices = @transform_8, window_bounds = array<i64: 1, 4>}, {transform_indices = @transform_9, window_bounds = array<i64: 256, 4>}]} {
    %c0 = arith.constant 0 : index
    %c0_0 = arith.constant 0 : index
    %0 = vector.load %arg1[%c0, %c0_0] : memref<256x256xbf16, #tpu.memory_space<vmem>>, vector<256x256xbf16>
    %c0_1 = arith.constant 0 : index
    %c0_2 = arith.constant 0 : index
    %1 = vector.load %arg2[%c0_1, %c0_2] : memref<256x128xbf16, #tpu.memory_space<vmem>>, vector<256x128xbf16>
    %cst = arith.constant dense<0.000000e+00> : vector<256x128xf32>
    %2 = tpu.matmul %0, %1, %cst {dimension_numbers = #tpu.dot_dimension_numbers<[1], [0], [0], [1], [0, 0, 1, 1], [], []>} : vector<256x256xbf16>, vector<256x128xbf16>, vector<256x128xf32> -> vector<256x128xf32>
    %c0_3 = arith.constant 0 : index
    %c0_4 = arith.constant 0 : index
    %3 = vector.load %arg3[%c0_3, %c0_4] : memref<1x128xf32, #tpu.memory_space<vmem>>, vector<1x128xf32>
    %4 = vector.broadcast %3 : vector<1x128xf32> to vector<256x128xf32>
    %5 = arith.addf %2, %4 : vector<256x128xf32>
    %6 = math.tanh %5 : vector<256x128xf32>
    %7 = arith.truncf %6 : vector<256x128xf32> to vector<256x128xbf16>
    %c0_5 = arith.constant 0 : index
    %c0_6 = arith.constant 0 : index
    %8 = vector.load %arg4[%c0_5, %c0_6] : memref<128x64xbf16, #tpu.memory_space<vmem>>, vector<128x64xbf16>
    %cst_7 = arith.constant dense<0.000000e+00> : vector<256x64xf32>
    %9 = tpu.matmul %7, %8, %cst_7 {dimension_numbers = #tpu.dot_dimension_numbers<[1], [0], [0], [1], [0, 0, 1, 1], [], []>} : vector<256x128xbf16>, vector<128x64xbf16>, vector<256x64xf32> -> vector<256x64xf32>
    %c0_8 = arith.constant 0 : index
    %c0_9 = arith.constant 0 : index
    %10 = vector.load %arg5[%c0_8, %c0_9] : memref<1x64xf32, #tpu.memory_space<vmem>>, vector<1x64xf32>
    %11 = vector.broadcast %10 : vector<1x64xf32> to vector<256x64xf32>
    %12 = arith.addf %9, %11 : vector<256x64xf32>
    %13 = math.tanh %12 : vector<256x64xf32>
    %14 = arith.truncf %13 : vector<256x64xf32> to vector<256x64xbf16>
    %c0_10 = arith.constant 0 : index
    %c0_11 = arith.constant 0 : index
    %15 = vector.load %arg6[%c0_10, %c0_11] : memref<64x32xbf16, #tpu.memory_space<vmem>>, vector<64x32xbf16>
    %cst_12 = arith.constant dense<0.000000e+00> : vector<256x32xf32>
    %16 = tpu.matmul %14, %15, %cst_12 {dimension_numbers = #tpu.dot_dimension_numbers<[1], [0], [0], [1], [0, 0, 1, 1], [], []>} : vector<256x64xbf16>, vector<64x32xbf16>, vector<256x32xf32> -> vector<256x32xf32>
    %c0_13 = arith.constant 0 : index
    %c0_14 = arith.constant 0 : index
    %17 = vector.load %arg7[%c0_13, %c0_14] : memref<1x32xf32, #tpu.memory_space<vmem>>, vector<1x32xf32>
    %18 = vector.broadcast %17 : vector<1x32xf32> to vector<256x32xf32>
    %19 = arith.addf %16, %18 : vector<256x32xf32>
    %20 = math.tanh %19 : vector<256x32xf32>
    %21 = arith.truncf %20 : vector<256x32xf32> to vector<256x32xbf16>
    %c0_15 = arith.constant 0 : index
    %c0_16 = arith.constant 0 : index
    %22 = vector.load %arg8[%c0_15, %c0_16] : memref<32x4xbf16, #tpu.memory_space<vmem>>, vector<32x4xbf16>
    %cst_17 = arith.constant dense<0.000000e+00> : vector<256x4xf32>
    %23 = tpu.matmul %21, %22, %cst_17 {dimension_numbers = #tpu.dot_dimension_numbers<[1], [0], [0], [1], [0, 0, 1, 1], [], []>} : vector<256x32xbf16>, vector<32x4xbf16>, vector<256x4xf32> -> vector<256x4xf32>
    %c0_18 = arith.constant 0 : index
    %c0_19 = arith.constant 0 : index
    %24 = vector.load %arg9[%c0_18, %c0_19] : memref<1x4xf32, #tpu.memory_space<vmem>>, vector<1x4xf32>
    %25 = vector.broadcast %24 : vector<1x4xf32> to vector<256x4xf32>
    %26 = arith.addf %23, %25 : vector<256x4xf32>
    %27 = math.tanh %26 : vector<256x4xf32>
    %c0_20 = arith.constant 0 : index
    %c0_21 = arith.constant 0 : index
    %28 = vector.load %arg10[%c0_20, %c0_21] : memref<256x4xf32, #tpu.memory_space<vmem>>, vector<256x4xf32>
    tpu.vector_store %arg10[%c0_20, %c0_21], %27 {strides = array<i32>} : memref<256x4xf32, #tpu.memory_space<vmem>>, vector<256x4xf32>,
    return
  }
  func.func @transform_0(%arg0: i32) -> (i32, i32) {
    %c0_i32 = arith.constant 0 : i32
    %c0_i32_0 = arith.constant 0 : i32
    return %arg0, %c0_i32 : i32, i32
  }
  func.func @transform_1(%arg0: i32) -> (i32, i32) {
    %c0_i32 = arith.constant 0 : i32
    %c0_i32_0 = arith.constant 0 : i32
    %c0_i32_1 = arith.constant 0 : i32
    return %c0_i32, %c0_i32_0 : i32, i32
  }
  func.func @transform_2(%arg0: i32) -> (i32, i32) {
    %c0_i32 = arith.constant 0 : i32
    %c0_i32_0 = arith.constant 0 : i32
    %c0_i32_1 = arith.constant 0 : i32
    return %c0_i32, %c0_i32_0 : i32, i32
  }
  func.func @transform_3(%arg0: i32) -> (i32, i32) {
    %c0_i32 = arith.constant 0 : i32
    %c0_i32_0 = arith.constant 0 : i32
    %c0_i32_1 = arith.constant 0 : i32
    return %c0_i32, %c0_i32_0 : i32, i32
  }
  func.func @transform_4(%arg0: i32) -> (i32, i32) {
    %c0_i32 = arith.constant 0 : i32
    %c0_i32_0 = arith.constant 0 : i32
    %c0_i32_1 = arith.constant 0 : i32
    return %c0_i32, %c0_i32_0 : i32, i32
  }
  func.func @transform_5(%arg0: i32) -> (i32, i32) {
    %c0_i32 = arith.constant 0 : i32
    %c0_i32_0 = arith.constant 0 : i32
    %c0_i32_1 = arith.constant 0 : i32
    return %c0_i32, %c0_i32_0 : i32, i32
  }
  func.func @transform_6(%arg0: i32) -> (i32, i32) {
    %c0_i32 = arith.constant 0 : i32
    %c0_i32_0 = arith.constant 0 : i32
    %c0_i32_1 = arith.constant 0 : i32
    return %c0_i32, %c0_i32_0 : i32, i32
  }
  func.func @transform_7(%arg0: i32) -> (i32, i32) {
    %c0_i32 = arith.constant 0 : i32
    %c0_i32_0 = arith.constant 0 : i32
    %c0_i32_1 = arith.constant 0 : i32
    return %c0_i32, %c0_i32_0 : i32, i32
  }
  func.func @transform_8(%arg0: i32) -> (i32, i32) {
    %c0_i32 = arith.constant 0 : i32
    %c0_i32_0 = arith.constant 0 : i32
    %c0_i32_1 = arith.constant 0 : i32
    return %c0_i32, %c0_i32_0 : i32, i32
  }
  func.func @transform_9(%arg0: i32) -> (i32, i32) {
    %c0_i32 = arith.constant 0 : i32
    %c0_i32_0 = arith.constant 0 : i32
    return %arg0, %c0_i32 : i32, i32
  }
}

</mosaic_0001>

<bundles_post_ra>
// kernel: tpu_custom_call.1
= control target key start
LH: loop header
LB: loop body
LE: loop exit
PB: predicated region body
PF: predicated region fallthrough
CT: control target
= control target key end

     0   :  { %14 = vsyncpa [#allocation3], 0  ;;  %s3384_s0 = inlined_call_operand.hbm [shape: bf16[512,256], index: 0, kind: input, shape index: {}]   ;;  %s3385_s1 = inlined_call_operand.vmem [shape: bf16[256,128], index: 1, kind: input, shape index: {}]   ;;  %s3386_s2 = inlined_call_operand.vmem [shape: f32[1,128], index: 2, kind: input, shape index: {}]   ;;  %s3387_s3 = inlined_call_operand.vmem [shape: bf16[128,64], index: 3, kind: input, shape index: {}]   ;;  %s3388_s4 = inlined_call_operand.hbm [shape: f32[1,64], index: 4, kind: input, shape index: {}]   ;;  %s3389_s5 = inlined_call_operand.vmem [shape: bf16[64,32], index: 5, kind: input, shape index: {}]   ;;  %s3390_s6 = inlined_call_operand.vmem [shape: f32[1,32], index: 6, kind: input, shape index: {}]   ;;  %s3391_s7 = inlined_call_operand.vmem [shape: bf16[32,4], index: 7, kind: input, shape index: {}]   ;;  %s3392_s8 = inlined_call_operand.vmem [shape: f32[1,4], index: 8, kind: input, shape index: {}]   ;;  %s3393_s9 = inlined_call_operand.vmem [shape: f32[512,4], index: 9, kind: output, shape index: {}]  }
   0x1   :  { %16 = vsyncpa [#allocation3 + $0x1], 0 }
   0x2   :  { %17 = vsyncpa [#allocation5], 0  ;;  %s2826_s30 = smov 0   ;;  %s2828_s10 = smov 0  }
   0x3   :  { %s2830_s11 = smov 0   ;;  %s2832_s12 = smov 0  }
   0x4 LB: > { %s3394_s13 = sadd.s32 4294967295, %s2770_s12   ;;  %s2846_s14 = sadd.s32 1, %s2770_s12   ;;  %s2770_s12 = sphi %s2832_s12, %s3414_s12   ;;  %s2766_s11 = sphi %s2830_s11, %s3413_s11   ;;  %s2762_s10 = sphi %s2828_s10, %s3412_s10   ;;  %s2758_s30 = sphi %s2826_s30, %s3411_s30  }
   0x5   : > { %s27_s15 = ssub.s32 %s2770_s12, %s2846_s14  ;;  %s30_s16 = sadd.s32 1, %s2766_s11 }
   0x6   : > { %p28_p0 = scmp.eq.s32.totalorder %s27_s15, 0  ;;  %p37_p1 = scmp.ne.s32.totalorder %s2766_s11, %s2762_s10 }
   0x7   : > { %p38_p2 = scmp.eq.s32.totalorder %s2770_s12, 0  ;;  %p43_p3 = scmp.ne.s32.totalorder %s2762_s10, %s2758_s30 }
   0x8   : > { %s2856_s17 = scalar_select %p28_p0, %s2766_s11, %s30_s16  }
   0x9   : > { %p2858_p4 = por %p38_p2, %p37_p1  ;;  %p2864_p5 = scmp.eq.s32.totalorder %s3394_s13, 0 }
   0xa   : > { %p1860_p6 = scmp.ge.s32.totalorder %s2770_s12, 1  ;;  %p248_p7 = scmp.lt.s32.totalorder %s2770_s12, 3 }
   0xb   : > { %s3401_s19 = scalar_select %p2864_p5, 1, 0 }
   0xc   : > { %p2872_p8 = por %p2864_p5, %p43_p3  ;;  %p2876_p9 = pnand %p1860_p6, %p248_p7 }
   0xd   : > { %s2772_s22 = smov [#allocation4]   ;;  %p2303_p11 = scmp.lt.s32.totalorder %s2770_s12, 2 }
   0xe   : > { %s3402_s20 = scalar_select %p2872_p8, 1, 0 }
   0xf   : > { %s3403_s21 = scalar_select %p2876_p9, 1, 0 }
  0x10   : > { %s270_s23 = sshll.u32 %s2772_s22, 4  ;;  %p2294_p10 = pneg %p2876_p9  ;;  %s271_s23 = int_to_ptr.vmem [resolvable:$true] %s270_s23 }
  0x11   : > { %s293_s24 = sand.u32 1, %s2766_s11   ;;  %p2892_p13 = pnand %p2303_p11, %p2858_p4 }
  0x12   : > { %p2886_p12 = pnand %p2294_p10, %p2864_p5  ;;  %s1863_s27 = sshll.u32 %s293_s24, 8 }
  0x13   : > { %s3405_s26 = scalar_select %p2892_p13, 1, 0 }
  0x14   : > { %s2674_s30 = scalar_lea.hbm %s3388_s4, 16  ;;  %p2676_p1 = pneg %p2886_p12 }
  0x15   : > { %p2675_p0 = scmp.ne.s32.totalorder %s3388_s4, %s2674_s30  ;;  %p2681_p4 = scmp.lt.u32.totalorder %s2674_s30, %s3388_s4 }
  0x17   : > { %p2677_p2 = pnand %p2676_p1, %p2675_p0 }
  0x19   : > { %p2678_p3 = pneg %p2677_p2 }
  0x1b   : > { %p2683_p6 = pnand %p2681_p4, %p2678_p3 }
  0x1d   : > { %2686 = shalt.err (!%p2683_p6)
}
  0x1e   : > { %s2687_s13 = scalar_lea.vmem %s271_s23, 16  ;;  %s2694_s28 = scalar_lea.vmem %s271_s23, 32 }
  0x1f   : > { %p2688_p7 = scmp.ne.s32.totalorder %s271_s23, %s2687_s13  ;;  %p2695_p5 = scmp.lt.s32.totalorder %s271_s23, %s271_s23 }
  0x20   : > { %p2696_p8 = scmp.lt.s32.totalorder %s2694_s28, %s2687_s13 }
  0x21   : > { %p2690_p10 = pnand %p2688_p7, %p2676_p1 }
  0x22   : > { %p2697_p9 = por %p2696_p8, %p2695_p5 }
  0x23   : > { %p2691_p11 = pneg %p2690_p10 }
  0x25   : > { %p2698_p13 = pnand %p2697_p9, %p2691_p11 }
  0x27   : > { %2701 = shalt.err (!%p2698_p13)
}
  0x28   : > { %2297 = dma.hbm_to_vmem [thread:$0]  (!%p2886_p12), %s3388_s4, 16, %s271_s23, [#allocation5]  }
  0x29   : > { %s1973_s30 = sshll.u32 %s2770_s12, 12  ;;  %s297_s13 = scalar_lea.vmem [#allocation2], %s1863_s27 }
  0x2a   : > { %s2916_s18 = scalar_lea.hbm %s3384_s0, %s1973_s30  ;;  %s305_s28 = sshll.u32 %s297_s13, 4  ;;  %s2918_s28 = int_to_ptr.vmem [resolvable:$true] %s305_s28 }
  0x2b   : > { %s2920_s25 = scalar_lea.sflag [#allocation3], %s293_s24  ;;  %s2702_s29 = scalar_lea.hbm %s2916_s18, 4096 }
  0x2c   : > { %p2703_p5 = scmp.ne.s32.totalorder %s2916_s18, %s2702_s29  ;;  %p3406_p8 = scmp.ne.s32.totalorder %s3405_s26, 0 }
  0x2d   : > { %s2707_s30 = scalar_lea.hbm %s3384_s0, 8192  ;;  %p2708_p0 = scmp.lt.u32.totalorder %s2916_s18, %s3384_s0 }
  0x2e   : > { %p2704_p9 = pneg %p3406_p8  ;;  %p2709_p1 = scmp.lt.u32.totalorder %s2707_s30, %s2702_s29 }
  0x2f   : > { %p2711_p3 = scmp.lt.u32.totalorder %s2702_s29, %s2916_s18 }
  0x30   : > { %p2705_p12 = pnand %p2704_p9, %p2703_p5  ;;  %p2710_p2 = por %p2709_p1, %p2708_p0 }
  0x32   : > { %p2706_p13 = pneg %p2705_p12  ;;  %p2712_p4 = por %p2711_p3, %p2710_p2 }
  0x34   : > { %p2713_p6 = pnand %p2712_p4, %p2706_p13 }
  0x36   : > { %2716 = shalt.err (!%p2713_p6)
}
  0x37   : > { %s2717_s24 = scalar_lea.vmem %s2918_s28, 4096  ;;  %s2773_s27 = smov [#allocation2]  }
  0x38   : > { %p2718_p7 = scmp.ne.s32.totalorder %s2918_s28, %s2717_s24  ;;  %s2722_s13 = sshll.u32 %s2773_s27, 4  ;;  %s2723_s13 = int_to_ptr.vmem [resolvable:$false] %s2722_s13 }
  0x39   : > { %s2724_s23 = scalar_lea.vmem %s2723_s13, 8192  ;;  %p2725_p5 = scmp.lt.s32.totalorder %s2918_s28, %s2723_s13 }
  0x3a   : > { %p2720_p10 = pnand %p2718_p7, %p2704_p9  ;;  %p2726_p12 = scmp.lt.s32.totalorder %s2724_s23, %s2717_s24 }
  0x3c   : > { %p2721_p11 = pneg %p2720_p10  ;;  %p2727_p0 = por %p2726_p12, %p2725_p5 }
  0x3e   : > { %p2728_p1 = pnand %p2727_p0, %p2721_p11 }
  0x40   : > { %2731 = shalt.err (!%p2728_p1)
}
  0x41   : > { %s2774_s29 = smov 128   ;;  %s2775_s15 = smov 8  }
  0x42   : > { %2301 = dma.hbm_to_vmem [thread:$0]  (!%p3406_p8), %s2916_s18, 4096, %s2918_s28, %s2920_s25, %s2774_s29, %s2774_s29, %s2775_s15  }
  0x43   : > { %p3407_p9 = scmp.ne.s32.totalorder %s3403_s21, 0 }
  0x44   : > { %s319_s30 = sand.u32 (!%p3407_p9), 1, %s2762_s10   ;;  %p3408_p13 = scmp.ne.s32.totalorder (!%p3407_p9), %s3402_s20, 0 }
  0x45   : > { %317 = sbr.rel (%p3407_p9) target bundleno = 1140 (0x474), region = 56  ;;  %s1868_s16 = sshll.u32 (!%p3407_p9), %s319_s30, 8 }
  0x46   : > { %s320_s22 = scalar_lea.sflag (!%p3407_p9), [#allocation3], %s319_s30  ;;  %s2951_s24 = scalar_lea.vmem (!%p3407_p9), [#allocation2], %s1868_s16 }
  0x4c   : > { %2749 = dma.done.wait (%p3408_p13), %s320_s22, 4096  }
  0x4d   : > { %2751 = vsyncadd (%p3408_p13), %s320_s22, 4294963200  ;;  %p3409_p2 = scmp.ne.s32.totalorder %s3401_s19, 0 }
  0x4f   : > { %2753 = dma.done.wait (%p3409_p2), [#allocation5], 16  }
  0x50   : > { %2755 = vsyncadd (%p3409_p2), [#allocation5], 4294967280  ;;  %v2340_v0 = vld [vmem:[%s3385_s1 + $0x40] sm:$0xff]   ;;  %v2342_v2 = vld [vmem:[%s3385_s1 + $0x48] sm:$0xff]   ;;  %vm1225_vm0 = vcmask 523264   ;;  %vm1506_vm1 = vcmask 261120  }
  0x51   : > { %v2341_v1 = vld [vmem:[%s3385_s1] sm:$0xff]   ;;  %1974 = vmatprep.subr.bf16.mxu0 %v2340_v0  ;;  %2272 = vmatprep.subr.bf16.mxu1 %v2340_v0  ;;  %v2343_v3 = vld [vmem:[%s3385_s1 + $0x8] sm:$0xff]   ;;  %v2344_v4 = vld [vmem:[%s3385_s1 + $0x50] sm:$0xff]   ;;  %s3410_s18 = sadd.s32 4294967295, %s2770_s12   ;;  %vm1748_vm2 = vcmask 31744  }
  0x52   : > { %1975 = vmatpush3.bf16.msra.mxu0 %v2341_v1  ;;  %2280 = vmatpush3.bf16.msra.mxu1 %v2341_v1  ;;  %v2345_v5 = vld [vmem:[%s3385_s1 + $0x10] sm:$0xff]   ;;  %v2346_v6 = vld [vmem:[%s3385_s1 + $0x58] sm:$0xff]   ;;  %v2348_v8 = vld [vmem:[%s3385_s1 + $0x60] sm:$0xff]   ;;  %s1870_s28 = sshll.u32 %s3410_s18, 5 }
  0x53   : > { %1976 = vmatprep.subr.bf16.mxu0 %v2342_v2  ;;  %2273 = vmatprep.subr.bf16.mxu1 %v2342_v2  ;;  %v2347_v7 = vld [vmem:[%s3385_s1 + $0x18] sm:$0xff]   ;;  %v2349_v9 = vld [vmem:[%s3385_s1 + $0x20] sm:$0xff]   ;;  %v2350_v10 = vld [vmem:[%s3385_s1 + $0x68] sm:$0xff]   ;;  %p364_p8 = scmp.lt.s32.totalorder %s1870_s28, 63 }
  0x54   : > { %v2358_v11 = vld [vmem:[%s2951_s24 + $0x4] ss:$8 sps:$4 sm:$0xff]   ;;  %v2352_v13 = vld [vmem:[%s3385_s1 + $0x70] sm:$0xff]   ;;  %v2354_v15 = vld [vmem:[%s3385_s1 + $0x78] sm:$0xff]  }
  0x55   : > { %v2351_v12 = vld [vmem:[%s3385_s1 + $0x28] sm:$0xff]   ;;  %729 = vmatprep.mubr.bf16.mxu0 %v2358_v11  ;;  %v2353_v14 = vld [vmem:[%s3385_s1 + $0x30] sm:$0xff]   ;;  %v2355_v16 = vld [vmem:[%s3385_s1 + $0x38] sm:$0xff]   ;;  %s3416_s28 = smov (!%p364_p8, %s1870_s28), 63 }
  0x56   : > { %1977 = vmatpush3.bf16.msra.mxu0 %v2343_v3  ;;  %2281 = vmatpush3.bf16.msra.mxu1 %v2343_v3  ;;  %v2356_v17 = vld [vmem:[%s2951_s24] ss:$8 sps:$4 sm:$0xff]   ;;  %v2388_v18 = vld [vmem:[%s2951_s24 + $0xc4] ss:$8 sps:$4 sm:$0xff]   ;;  %v2359_v19 = vld [vmem:[%s2951_s24 + $0x14] ss:$8 sps:$4 sm:$0xff]  }
  0x57   : > { %1978 = vmatprep.subr.bf16.mxu0 %v2344_v4  ;;  %2274 = vmatprep.subr.bf16.mxu1 %v2344_v4  ;;  %v2386_v20 = vld [vmem:[%s2951_s24 + $0xc0] ss:$8 sps:$4 sm:$0xff]   ;;  %v2392_v21 = vld [vmem:[%s2951_s24 + $0xd4] ss:$8 sps:$4 sm:$0xff]   ;;  %v2361_v22 = vld [vmem:[%s2951_s24 + $0x10] ss:$8 sps:$4 sm:$0xff]  }
  0x58   : > { %825 = vmatprep.mubr.bf16.mxu1 %v2388_v18  ;;  %v2362_v23 = vld [vmem:[%s2951_s24 + $0x24] ss:$8 sps:$4 sm:$0xff]   ;;  %v2394_v24 = vld [vmem:[%s2951_s24 + $0xd0] ss:$8 sps:$4 sm:$0xff]   ;;  %v2364_v27 = vld [vmem:[%s2951_s24 + $0x20] ss:$8 sps:$4 sm:$0xff]  }
  0x59   : > { %v2398_v25 = vld [vmem:[%s2951_s24 + $0xe4] ss:$8 sps:$4 sm:$0xff]   ;;  %v2365_v28 = vld [vmem:[%s2951_s24 + $0x34] ss:$8 sps:$4 sm:$0xff]   ;;  %v2400_v29 = vld [vmem:[%s2951_s24 + $0xe0] ss:$8 sps:$4 sm:$0xff]  }
  0x5a   : > { %1979 = vmatpush3.bf16.msra.mxu0 %v2345_v5  ;;  %2282 = vmatpush3.bf16.msra.mxu1 %v2345_v5  ;;  %v2404_v26 = vld [vmem:[%s3387_s3] sm:$0xff]   ;;  %v2401_v30 = vld [vmem:[%s2951_s24 + $0xf4] ss:$8 sps:$4 sm:$0xff]   ;;  %v2367_v31 = vld [vmem:[%s2951_s24 + $0x30] ss:$8 sps:$4 sm:$0xff]   ;;  %s1871_s12 = sshll.u32 %s3416_s28, 3 }
  0x5b   : > { %1980 = vmatprep.subr.bf16.mxu0 %v2346_v6  ;;  %2275 = vmatprep.subr.bf16.mxu1 %v2346_v6  ;;  %v2368_v32 = vld [vmem:[%s2951_s24 + $0x44] ss:$8 sps:$4 sm:$0xff]   ;;  %v2403_v33 = vld [vmem:[%s2951_s24 + $0xf0] ss:$8 sps:$4 sm:$0xff]   ;;  %v2370_v34 = vld [vmem:[%s2951_s24 + $0x40] ss:$8 sps:$4 sm:$0xff]   ;;  %s3277_s19 = scalar_lea.vmem %s3393_s9, %s1871_s12 }
  0x5c   : > { %v2371_v35 = vld [vmem:[%s2951_s24 + $0x54] ss:$8 sps:$4 sm:$0xff]   ;;  %v2373_v36 = vld [vmem:[%s2951_s24 + $0x50] ss:$8 sps:$4 sm:$0xff]   ;;  %v2374_v37 = vld [vmem:[%s2951_s24 + $0x64] ss:$8 sps:$4 sm:$0xff]  }
  0x5d   : > { %v2376_v38 = vld [vmem:[%s2951_s24 + $0x60] ss:$8 sps:$4 sm:$0xff]   ;;  %v2377_v39 = vld [vmem:[%s2951_s24 + $0x74] ss:$8 sps:$4 sm:$0xff]   ;;  %v2379_v40 = vld [vmem:[%s2951_s24 + $0x70] ss:$8 sps:$4 sm:$0xff]  }
  0x5e   : > { %1981 = vmatpush3.bf16.msra.mxu0 %v2347_v7  ;;  %2283 = vmatpush3.bf16.msra.mxu1 %v2347_v7  ;;  %v2380_v41 = vld [vmem:[%s2951_s24 + $0x84] ss:$8 sps:$4 sm:$0xff]   ;;  %v2382_v42 = vld [vmem:[%s2951_s24 + $0x80] ss:$8 sps:$4 sm:$0xff]   ;;  %v2383_v43 = vld [vmem:[%s2951_s24 + $0x94] ss:$8 sps:$4 sm:$0xff]  }
  0x5f   : > { %1982 = vmatprep.subr.bf16.mxu0 %v2348_v8  ;;  %2276 = vmatprep.subr.bf16.mxu1 %v2348_v8  ;;  %v2385_v44 = vld [vmem:[%s2951_s24 + $0x90] ss:$8 sps:$4 sm:$0xff]   ;;  %v2389_v45 = vld [vmem:[%s2951_s24 + $0xa4] ss:$8 sps:$4 sm:$0xff]   ;;  %v2391_v46 = vld [vmem:[%s2951_s24 + $0xa0] ss:$8 sps:$4 sm:$0xff]  }
  0x60   : > { %v2395_v47 = vld [vmem:[%s2951_s24 + $0xb4] ss:$8 sps:$4 sm:$0xff]   ;;  %v2405_v48 = vld [vmem:[%s3387_s3 + $0x8] sm:$0xff]   ;;  %v2397_v49 = vld [vmem:[%s2951_s24 + $0xb0] ss:$8 sps:$4 sm:$0xff]  }
  0x61   : > { %v2406_v50 = vld [vmem:[%s3387_s3 + $0x10] sm:$0xff]   ;;  %v2407_v51 = vld [vmem:[%s3387_s3 + $0x18] sm:$0xff]   ;;  %v2408_v52 = vld [vmem:[%s3387_s3 + $0x20] sm:$0xff]  }
  0x62   : > { %1983 = vmatpush3.bf16.msra.mxu0 %v2349_v9  ;;  %2284 = vmatpush3.bf16.msra.mxu1 %v2349_v9  ;;  %v2409_v53 = vld [vmem:[%s3387_s3 + $0x28] sm:$0xff]   ;;  %v2410_v54 = vld [vmem:[%s3387_s3 + $0x30] sm:$0xff]   ;;  %v2411_v55 = vld [vmem:[%s3387_s3 + $0x38] sm:$0xff]  }
  0x63   : > { %1984 = vmatprep.subr.bf16.mxu0 %v2350_v10  ;;  %2277 = vmatprep.subr.bf16.mxu1 %v2350_v10  ;;  %v3068_v56 = vld [vmem:[%s3389_s5] sm:$0xff]  }
  0x64   : > { %v3074_v58 = vld [vmem:[%s3386_s2] ss:$0 sm:$0xff] }
  0x66   : > { %1985 = vmatpush3.bf16.msra.mxu0 %v2351_v12  ;;  %2285 = vmatpush3.bf16.msra.mxu1 %v2351_v12 }
  0x67   : > { %1986 = vmatprep.subr.bf16.mxu0 %v2352_v13  ;;  %2278 = vmatprep.subr.bf16.mxu1 %v2352_v13 }
  0x6a   : > { %1987 = vmatpush3.bf16.msra.mxu0 %v2353_v14  ;;  %2286 = vmatpush3.bf16.msra.mxu1 %v2353_v14 }
  0x6b   : > { %1988 = vmatprep.subr.bf16.mxu0 %v2354_v15  ;;  %2279 = vmatprep.subr.bf16.mxu1 %v2354_v15 }
  0x6e   : > { %1989 = vmatpush3.bf16.msra.mxu0 %v2355_v16  ;;  %2287 = vmatpush3.bf16.msra.mxu1 %v2355_v16 }
  0x6f   : > { %2148 = vmatprep.subr.bf16.mxu1 %v2404_v26 }
  0x71   : > { %730 = vmatmul.mubr.bf16.vlgmr.msra.gmra.mrb[0].mxu0 %v2356_v17  ;;  %826 = vmatmul.mubr.bf16.vlgmr.msra.gmra.mrb[0].mxu1 %v2386_v20 }
  0x72   : > { %737 = vmatprep.mubr.bf16.mxu0 %v2359_v19  ;;  %833 = vmatprep.mubr.bf16.mxu1 %v2392_v21 }
  0x73   : > { %2149 = vmatpush3.bf16.msra.mxu1 %v2404_v26 }
  0x74   : > { %2150 = vmatprep.subr.bf16.mxu1 %v2405_v48 }
  0x77   : > { %2151 = vmatpush3.bf16.msra.mxu1 %v2405_v48 }
  0x78   : > { %2152 = vmatprep.subr.bf16.mxu1 %v2406_v50 }
  0x79   : > { %738 = vmatmul.mubr.bf16.gmra.mrb[4].mxu0 %v2361_v22  ;;  %834 = vmatmul.mubr.bf16.gmra.mrb[4].mxu1 %v2394_v24 }
  0x7a   : > { %745 = vmatprep.mubr.bf16.mxu0 %v2362_v23  ;;  %841 = vmatprep.mubr.bf16.mxu1 %v2398_v25 }
  0x7b   : > { %2153 = vmatpush3.bf16.msra.mxu1 %v2406_v50 }
  0x7c   : > { %2154 = vmatprep.subr.bf16.mxu1 %v2407_v51 }
  0x7f   : > { %2155 = vmatpush3.bf16.msra.mxu1 %v2407_v51 }
  0x80   : > { %2156 = vmatprep.subr.bf16.mxu1 %v2408_v52 }
  0x81   : > { %746 = vmatmul.mubr.bf16.gmra.mrb[8].mxu0 %v2364_v27  ;;  %842 = vmatmul.mubr.bf16.gmra.mrb[8].mxu1 %v2400_v29 }
  0x82   : > { %753 = vmatprep.mubr.bf16.mxu0 %v2365_v28  ;;  %849 = vmatprep.mubr.bf16.mxu1 %v2401_v30 }
  0x83   : > { %2157 = vmatpush3.bf16.msra.mxu1 %v2408_v52 }
  0x84   : > { %2158 = vmatprep.subr.bf16.mxu1 %v2409_v53 }
  0x87   : > { %2159 = vmatpush3.bf16.msra.mxu1 %v2409_v53 }
  0x88   : > { %2160 = vmatprep.subr.bf16.mxu1 %v2410_v54 }
  0x89   : > { %754 = vmatmul.mubr.bf16.gmra.mrb[12].mxu0 %v2367_v31  ;;  %850 = vmatmul.mubr.bf16.gmra.mrb[12].mxu1 %v2403_v33 }
  0x8a   : > { %761 = vmatprep.mubr.bf16.mxu0 %v2368_v32 }
  0x8b   : > { %2161 = vmatpush3.bf16.msra.mxu1 %v2410_v54 }
  0x8c   : > { %2162 = vmatprep.subr.bf16.mxu1 %v2411_v55 }
  0x8f   : > { %2163 = vmatpush3.bf16.msra.mxu1 %v2411_v55 }
  0x90   : > { %2196 = vmatprep.subr.bf16.mxu1 %v3068_v56 }
  0x91   : > { %762 = vmatmul.mubr.bf16.gmra.mrb[16].mxu0 %v2370_v34 }
  0x92   : > { %769 = vmatprep.mubr.bf16.mxu0 %v2371_v35 }
  0x99   : > { %770 = vmatmul.mubr.bf16.gmra.mrb[20].mxu0 %v2373_v36 }
  0x9a   : > { %777 = vmatprep.mubr.bf16.mxu0 %v2374_v37 }
  0xa1   : > { %778 = vmatmul.mubr.bf16.gmra.mrb[24].mxu0 %v2376_v38 }
  0xa2   : > { %785 = vmatprep.mubr.bf16.mxu0 %v2377_v39 }
  0xa9   : > { %786 = vmatmul.mubr.bf16.gmra.mrb[28].mxu0 %v2379_v40 }
  0xaa   : > { %793 = vmatprep.mubr.bf16.mxu0 %v2380_v41 }
  0xb1   : > { %794 = vmatmul.mubr.bf16.gmra.mrb[32].mxu0 %v2382_v42 }
  0xb2   : > { %801 = vmatprep.mubr.bf16.mxu0 %v2383_v43 }
  0xb9   : > { %802 = vmatmul.mubr.bf16.gmra.mrb[36].mxu0 %v2385_v44 }
  0xba   : > { %809 = vmatprep.mubr.bf16.mxu0 %v2389_v45 }
  0xc1   : > { %810 = vmatmul.mubr.bf16.gmra.mrb[40].mxu0 %v2391_v46 }
  0xc2   : > { %817 = vmatprep.mubr.bf16.mxu0 %v2395_v47 }
  0xc9   : > { %818 = vmatmul.mubr.bf16.gmra.mrb[44].mxu0 %v2397_v49 }
 0x144   : > { %v1990_v57 = vpop.f32.mrb[0].mxu0  ;;  %v2062_v60 = vpop.f32.mrb[0].mxu1 }
 0x145   : > { %v1991_v59 = vpop.f32.mrb[1].mxu0  ;;  %v2063_v63 = vpop.f32.mrb[1].mxu1 }
 0x146   : > { %v1992_v61 = vadd.f32 %v1991_v59, %v1990_v57  ;;  %v1993_v62 = vpop.f32.mrb[2].mxu0  ;;  %v2064_v1 = vadd.f32 %v2063_v63, %v2062_v60  ;;  %v2065_v2 = vpop.f32.mrb[2].mxu1 }
 0x147   : > { %v1994_v0 = vpop.f32.mrb[3].mxu0  ;;  %v2066_v5 = vpop.f32.mrb[3].mxu1 }
 0x148   : > { %v732_v3 = vadd.f32 %v1992_v61, %v3074_v58  ;;  %v1995_v4 = vadd.f32 %v1994_v0, %v1993_v62  ;;  %v828_v6 = vadd.f32 %v2064_v1, %v3074_v58  ;;  %v2067_v7 = vadd.f32 %v2066_v5, %v2065_v2 }
 0x14a   : > { %2418 = vtanh.f32 %v732_v3  ;;  %v735_v8 = vadd.f32 %v1995_v4, %v3074_v58  ;;  %v831_v9 = vadd.f32 %v2067_v7, %v3074_v58 }
 0x14b   : > { %2420 = vtanh.f32 %v828_v6 }
 0x14c   : > { %2422 = vtanh.f32 %v735_v8  ;;  %v1996_v10 = vpop.f32.mrb[4].mxu0  ;;  %v2068_v12 = vpop.f32.mrb[4].mxu1 }
 0x14d   : > { %v1997_v11 = vpop.f32.mrb[5].mxu0  ;;  %2424 = vtanh.f32 %v831_v9  ;;  %v2069_v15 = vpop.f32.mrb[5].mxu1 }
 0x14e   : > { %v1998_v13 = vadd.f32 %v1997_v11, %v1996_v10  ;;  %v1999_v14 = vpop.f32.mrb[6].mxu0  ;;  %v2070_v17 = vadd.f32 %v2069_v15, %v2068_v12  ;;  %v2071_v18 = vpop.f32.mrb[6].mxu1 }
 0x14f   : > { %v2000_v16 = vpop.f32.mrb[7].mxu0  ;;  %v2072_v21 = vpop.f32.mrb[7].mxu1 }
 0x150   : > { %v740_v19 = vadd.f32 %v1998_v13, %v3074_v58  ;;  %v2001_v20 = vadd.f32 %v2000_v16, %v1999_v14  ;;  %v836_v22 = vadd.f32 %v2070_v17, %v3074_v58  ;;  %v2073_v23 = vadd.f32 %v2072_v21, %v2071_v18 }
 0x152   : > { %2426 = vtanh.f32 %v740_v19  ;;  %v743_v24 = vadd.f32 %v2001_v20, %v3074_v58  ;;  %v839_v25 = vadd.f32 %v2073_v23, %v3074_v58 }
 0x153   : > { %2428 = vtanh.f32 %v836_v22 }
 0x154   : > { %v2419_v26 = vpop.eup %2418  ;;  %2430 = vtanh.f32 %v743_v24  ;;  %v2002_v27 = vpop.f32.mrb[8].mxu0 }
 0x155   : > { %v3084_v28 = vpop.eup %2420  ;;  %v2003_v29 = vpop.f32.mrb[9].mxu0  ;;  %2432 = vtanh.f32 %v839_v25 }
 0x156   : > { %v2074_v30 = vpop.f32.mrb[8].mxu1  ;;  %v2423_v31 = vpop.eup %2422  ;;  %v2004_v32 = vadd.f32 %v2003_v29, %v2002_v27 }
 0x157   : > { %v2005_v33 = vpop.f32.mrb[10].mxu0  ;;  %v2075_v34 = vpop.f32.mrb[9].mxu1  ;;  %v890_v37 = vpack.c.bf16 %v2423_v31, %v2419_v26 }
 0x158   : > { %v3086_v35 = vpop.eup %2424  ;;  %v2006_v36 = vpop.f32.mrb[11].mxu0  ;;  %v2076_v38 = vadd.f32 %v2075_v34, %v2074_v30  ;;  %v748_v40 = vadd.f32 %v2004_v32, %v3074_v58 }
 0x159   : > { %v2077_v39 = vpop.f32.mrb[10].mxu1  ;;  %v2007_v41 = vadd.f32 %v2006_v36, %v2005_v33  ;;  %v902_v43 = vpack.c.bf16 %v3086_v35, %v3084_v28  ;;  %2164 = vmatprep.mubr.bf16.mxu1 %v890_v37  ;;  %v2415_v28 = vld [vmem:[%s3389_s5 + $0x18] sm:$0xff]   ;;  %v2416_v35 = vld [vmem:[%s3391_s7] sm:$0xff]  }
 0x15a   : > { %v2078_v42 = vpop.f32.mrb[11].mxu1  ;;  %v844_v44 = vadd.f32 %v2076_v38, %v3074_v58  ;;  %2434 = vtanh.f32 %v748_v40  ;;  %2236 = vmatprep.subr.bf16.mxu0 %v2416_v35 }
 0x15b   : > { %v2079_v45 = vadd.f32 %v2078_v42, %v2077_v39  ;;  %v751_v46 = vadd.f32 %v2007_v41, %v3074_v58  ;;  %2237 = vmatpush3.bf16.msra.mxu0 %v2416_v35 }
 0x15c   : > { %2436 = vtanh.f32 %v844_v44  ;;  %v2427_v48 = vpop.eup %2426  ;;  %v2008_v49 = vpop.f32.mrb[12].mxu0 }
 0x15d   : > { %v847_v47 = vadd.f32 %v2079_v45, %v3074_v58  ;;  %2438 = vtanh.f32 %v751_v46  ;;  %v3094_v50 = vpop.eup %2428  ;;  %v2009_v51 = vpop.f32.mrb[13].mxu0 }
 0x15e   : > { %v2080_v52 = vpop.f32.mrb[12].mxu1  ;;  %v2431_v53 = vpop.eup %2430  ;;  %v2010_v54 = vadd.f32 %v2009_v51, %v2008_v49 }
 0x15f   : > { %2440 = vtanh.f32 %v847_v47  ;;  %v2011_v55 = vpop.f32.mrb[14].mxu0  ;;  %v2081_v57 = vpop.f32.mrb[13].mxu1  ;;  %v891_v61 = vpack.c.bf16 %v2431_v53, %v2427_v48 }
 0x160   : > { %v3096_v59 = vpop.eup %2432  ;;  %v2012_v60 = vpop.f32.mrb[15].mxu0  ;;  %v2082_v62 = vadd.f32 %v2081_v57, %v2080_v52  ;;  %v756_v0 = vadd.f32 %v2010_v54, %v3074_v58 }
 0x161   : > { %v2083_v63 = vpop.f32.mrb[14].mxu1  ;;  %v2013_v1 = vadd.f32 %v2012_v60, %v2011_v55  ;;  %v903_v3 = vpack.c.bf16 %v3096_v59, %v3094_v50  ;;  %2165 = vmatmul.mubr.bf16.vlgmr.msra.gmra.mrb[16].mxu1 %v891_v61 }
 0x162   : > { %v2084_v2 = vpop.f32.mrb[15].mxu1  ;;  %v852_v4 = vadd.f32 %v2082_v62, %v3074_v58  ;;  %2442 = vtanh.f32 %v756_v0  ;;  %2197 = vmatpush3.bf16.msra.mxu1 %v3068_v56 }
 0x163   : > { %v2085_v5 = vadd.f32 %v2084_v2, %v2083_v63  ;;  %v759_v6 = vadd.f32 %v2013_v1, %v3074_v58 }
 0x164   : > { %2444 = vtanh.f32 %v852_v4  ;;  %v2435_v8 = vpop.eup %2434  ;;  %v2014_v9 = vpop.f32.mrb[16].mxu0 }
 0x165   : > { %v855_v7 = vadd.f32 %v2085_v5, %v3074_v58  ;;  %2446 = vtanh.f32 %v759_v6  ;;  %v2015_v11 = vpop.f32.mrb[17].mxu0 }
 0x166   : > { %v3105_v10 = vpop.eup %2436  ;;  %v2016_v13 = vadd.f32 %v2015_v11, %v2014_v9  ;;  %v2017_v14 = vpop.f32.mrb[18].mxu0 }
 0x167   : > { %2448 = vtanh.f32 %v855_v7  ;;  %v2439_v12 = vpop.eup %2438  ;;  %v2018_v16 = vpop.f32.mrb[19].mxu0 }
 0x168   : > { %v892_v17 = vpack.c.bf16 %v2439_v12, %v2435_v8  ;;  %v764_v18 = vadd.f32 %v2016_v13, %v3074_v58  ;;  %v2019_v56 = vadd.f32 %v2018_v16, %v2017_v14 }
 0x169   : > { %v3107_v15 = vpop.eup %2440 }
 0x16a   : > { %v904_v19 = vpack.c.bf16 %v3107_v15, %v3105_v10  ;;  %2168 = vmatprep.mubr.bf16.mxu1 %v892_v17  ;;  %v767_v20 = vadd.f32 %v2019_v56, %v3074_v58  ;;  %2450 = vtanh.f32 %v764_v18 }
 0x16c   : > { %v2443_v21 = vpop.eup %2442  ;;  %2452 = vtanh.f32 %v767_v20  ;;  %v2020_v22 = vpop.f32.mrb[20].mxu0 }
 0x16d   : > { %v2021_v24 = vpop.f32.mrb[21].mxu0 }
 0x16e   : > { %v3113_v23 = vpop.eup %2444  ;;  %v2022_v26 = vadd.f32 %v2021_v24, %v2020_v22  ;;  %v2023_v27 = vpop.f32.mrb[22].mxu0 }
 0x16f   : > { %v2447_v25 = vpop.eup %2446  ;;  %v2024_v30 = vpop.f32.mrb[23].mxu0 }
 0x170   : > { %v893_v31 = vpack.c.bf16 %v2447_v25, %v2443_v21  ;;  %v772_v32 = vadd.f32 %v2022_v26, %v3074_v58  ;;  %v2025_v33 = vadd.f32 %v2024_v30, %v2023_v27 }
 0x171   : > { %v3115_v29 = vpop.eup %2448 }
 0x172   : > { %v905_v34 = vpack.c.bf16 %v3115_v29, %v3113_v23  ;;  %2169 = vmatmul.mubr.bf16.gmra.mrb[20].mxu1 %v893_v31  ;;  %v775_v36 = vadd.f32 %v2025_v33, %v3074_v58  ;;  %2454 = vtanh.f32 %v772_v32 }
 0x174   : > { %2456 = vtanh.f32 %v775_v36  ;;  %v2026_v37 = vpop.f32.mrb[24].mxu0  ;;  %v2451_v38 = vpop.eup %2450 }
 0x175   : > { %v2027_v39 = vpop.f32.mrb[25].mxu0 }
 0x176   : > { %v2453_v40 = vpop.eup %2452  ;;  %v2028_v41 = vadd.f32 %v2027_v39, %v2026_v37  ;;  %v2029_v42 = vpop.f32.mrb[26].mxu0 }
 0x177   : > { %v2030_v44 = vpop.f32.mrb[27].mxu0  ;;  %v894_v45 = vpack.c.bf16 %v2453_v40, %v2451_v38 }
 0x178   : > { %v780_v46 = vadd.f32 %v2028_v41, %v3074_v58  ;;  %v2031_v47 = vadd.f32 %v2030_v44, %v2029_v42 }
 0x179   : > { %2172 = vmatprep.mubr.bf16.mxu1 %v894_v45 }
 0x17a   : > { %v783_v48 = vadd.f32 %v2031_v47, %v3074_v58  ;;  %2458 = vtanh.f32 %v780_v46 }
 0x17c   : > { %2460 = vtanh.f32 %v783_v48  ;;  %v2032_v49 = vpop.f32.mrb[28].mxu0  ;;  %v2455_v51 = vpop.eup %2454 }
 0x17d   : > { %v2033_v52 = vpop.f32.mrb[29].mxu0 }
 0x17e   : > { %v2457_v53 = vpop.eup %2456  ;;  %v2034_v54 = vadd.f32 %v2033_v52, %v2032_v49  ;;  %v2035_v55 = vpop.f32.mrb[30].mxu0 }
 0x17f   : > { %v2036_v57 = vpop.f32.mrb[31].mxu0  ;;  %v895_v60 = vpack.c.bf16 %v2457_v53, %v2455_v51 }
 0x180   : > { %v788_v61 = vadd.f32 %v2034_v54, %v3074_v58  ;;  %v2037_v62 = vadd.f32 %v2036_v57, %v2035_v55 }
 0x181   : > { %2173 = vmatmul.mubr.bf16.gmra.mrb[24].mxu1 %v895_v60 }
 0x182   : > { %v791_v63 = vadd.f32 %v2037_v62, %v3074_v58  ;;  %2462 = vtanh.f32 %v788_v61 }
 0x184   : > { %2464 = vtanh.f32 %v791_v63  ;;  %v2038_v0 = vpop.f32.mrb[32].mxu0  ;;  %v2459_v1 = vpop.eup %2458  ;;  %v2414_v63 = vld [vmem:[%s3389_s5 + $0x10] sm:$0xff]  }
 0x185   : > { %v2039_v2 = vpop.f32.mrb[33].mxu0 }
 0x186   : > { %v2461_v4 = vpop.eup %2460  ;;  %v2040_v5 = vadd.f32 %v2039_v2, %v2038_v0  ;;  %v2041_v6 = vpop.f32.mrb[34].mxu0 }
 0x187   : > { %v2042_v7 = vpop.f32.mrb[35].mxu0  ;;  %v896_v8 = vpack.c.bf16 %v2461_v4, %v2459_v1 }
 0x188   : > { %v796_v9 = vadd.f32 %v2040_v5, %v3074_v58  ;;  %v2043_v11 = vadd.f32 %v2042_v7, %v2041_v6 }
 0x189   : > { %2176 = vmatprep.mubr.bf16.mxu1 %v896_v8 }
 0x18a   : > { %v799_v12 = vadd.f32 %v2043_v11, %v3074_v58  ;;  %2466 = vtanh.f32 %v796_v9 }
 0x18c   : > { %2468 = vtanh.f32 %v799_v12  ;;  %v2044_v13 = vpop.f32.mrb[36].mxu0  ;;  %v2463_v14 = vpop.eup %2462 }
 0x18d   : > { %v2045_v16 = vpop.f32.mrb[37].mxu0 }
 0x18e   : > { %v2465_v17 = vpop.eup %2464  ;;  %v2046_v18 = vadd.f32 %v2045_v16, %v2044_v13  ;;  %v2047_v56 = vpop.f32.mrb[38].mxu0 }
 0x18f   : > { %v2048_v20 = vpop.f32.mrb[39].mxu0  ;;  %v897_v21 = vpack.c.bf16 %v2465_v17, %v2463_v14 }
 0x190   : > { %v804_v22 = vadd.f32 %v2046_v18, %v3074_v58  ;;  %v2049_v24 = vadd.f32 %v2048_v20, %v2047_v56 }
 0x191   : > { %2177 = vmatmul.mubr.bf16.gmra.mrb[28].mxu1 %v897_v21 }
 0x192   : > { %v807_v25 = vadd.f32 %v2049_v24, %v3074_v58  ;;  %2470 = vtanh.f32 %v804_v22 }
 0x194   : > { %2472 = vtanh.f32 %v807_v25  ;;  %v2050_v26 = vpop.f32.mrb[40].mxu0  ;;  %v2467_v27 = vpop.eup %2466 }
 0x195   : > { %v2051_v30 = vpop.f32.mrb[41].mxu0 }
 0x196   : > { %v2469_v31 = vpop.eup %2468  ;;  %v2052_v32 = vadd.f32 %v2051_v30, %v2050_v26  ;;  %v2053_v33 = vpop.f32.mrb[42].mxu0 }
 0x197   : > { %v2054_v36 = vpop.f32.mrb[43].mxu0  ;;  %v898_v37 = vpack.c.bf16 %v2469_v31, %v2467_v27 }
 0x198   : > { %v812_v38 = vadd.f32 %v2052_v32, %v3074_v58  ;;  %v2055_v39 = vadd.f32 %v2054_v36, %v2053_v33 }
 0x199   : > { %2180 = vmatprep.mubr.bf16.mxu1 %v898_v37 }
 0x19a   : > { %v815_v40 = vadd.f32 %v2055_v39, %v3074_v58  ;;  %2474 = vtanh.f32 %v812_v38 }
 0x19c   : > { %2476 = vtanh.f32 %v815_v40  ;;  %v2056_v41 = vpop.f32.mrb[44].mxu0  ;;  %v2471_v42 = vpop.eup %2470 }
 0x19d   : > { %v2057_v44 = vpop.f32.mrb[45].mxu0 }
 0x19e   : > { %v2473_v45 = vpop.eup %2472  ;;  %v2058_v46 = vadd.f32 %v2057_v44, %v2056_v41  ;;  %v2059_v47 = vpop.f32.mrb[46].mxu0 }
 0x19f   : > { %v2060_v48 = vpop.f32.mrb[47].mxu0  ;;  %v899_v49 = vpack.c.bf16 %v2473_v45, %v2471_v42 }
 0x1a0   : > { %v820_v51 = vadd.f32 %v2058_v46, %v3074_v58  ;;  %v2061_v52 = vadd.f32 %v2060_v48, %v2059_v47 }
 0x1a1   : > { %2181 = vmatmul.mubr.bf16.gmra.mrb[32].mxu1 %v899_v49 }
 0x1a2   : > { %v823_v53 = vadd.f32 %v2061_v52, %v3074_v58  ;;  %2478 = vtanh.f32 %v820_v51  ;;  %v2413_v58 = vld [vmem:[%s3389_s5 + $0x8] sm:$0xff]  }
 0x1a3   : > { %2198 = vmatprep.subr.bf16.mxu1 %v2413_v58 }
 0x1a4   : > { %2480 = vtanh.f32 %v823_v53  ;;  %v2475_v54 = vpop.eup %2474  ;;  %2199 = vmatpush3.bf16.msra.mxu1 %v2413_v58 }
 0x1a5   : > { %2200 = vmatprep.subr.bf16.mxu1 %v2414_v63 }
 0x1a6   : > { %v2477_v55 = vpop.eup %2476 }
 0x1a7   : > { %v900_v57 = vpack.c.bf16 %v2477_v55, %v2475_v54 }
 0x1a8   : > { %2201 = vmatpush3.bf16.msra.mxu1 %v2414_v63 }
 0x1a9   : > { %2184 = vmatprep.mubr.bf16.mxu1 %v900_v57  ;;  %2202 = vmatprep.subr.bf16.mxu1 %v2415_v28 }
 0x1ac   : > { %v2479_v60 = vpop.eup %2478  ;;  %2203 = vmatpush3.bf16.msra.mxu1 %v2415_v28 }
 0x1ae   : > { %v2481_v61 = vpop.eup %2480 }
 0x1af   : > { %v901_v62 = vpack.c.bf16 %v2481_v61, %v2479_v60 }
 0x1b1   : > { %2185 = vmatmul.mubr.bf16.gmra.mrb[36].mxu1 %v901_v62 }
 0x1b2   : > { %2188 = vmatprep.mubr.bf16.mxu1 %v902_v43  ;;  %v3157_v43 = vld [vmem:[#allocation4] ss:$0 sm:$0xff] }
 0x1b9   : > { %2189 = vmatmul.mubr.bf16.gmra.mrb[40].mxu1 %v903_v3 }
 0x1ba   : > { %2192 = vmatprep.mubr.bf16.mxu1 %v904_v19 }
 0x1c1   : > { %2193 = vmatmul.mubr.bf16.gmra.mrb[44].mxu1 %v905_v34 }
 0x234   : > { %v2166_v50 = vpop.f32.mrb[16].mxu1 }
 0x235   : > { %v1020_v59 = vadd.f32 %v2166_v50, %v3157_v43  ;;  %v1011_v3 = vpop.f32.mrb[17].mxu1 }
 0x236   : > { %v1012_v10 = vadd.f32 %v3157_v43, %v1011_v3  ;;  %v2167_v15 = vpop.f32.mrb[18].mxu1 }
 0x237   : > { %2482 = vtanh.f32 %v1020_v59  ;;  %v1023_v19 = vadd.f32 %v2167_v15, %v3157_v43  ;;  %v1014_v23 = vpop.f32.mrb[19].mxu1 }
 0x238   : > { %2484 = vtanh.f32 %v1012_v10  ;;  %v1015_v29 = vadd.f32 %v3157_v43, %v1014_v23 }
 0x239   : > { %2486 = vtanh.f32 %v1023_v19 }
 0x23a   : > { %2488 = vtanh.f32 %v1015_v29 }
 0x241   : > { %v2483_v34 = vpop.eup %2482 }
 0x242   : > { %v2485_v0 = vpop.eup %2484 }
 0x243   : > { %v2487_v1 = vpop.eup %2486 }
 0x244   : > { %v2489_v2 = vpop.eup %2488  ;;  %v1171_v4 = vpack.c.bf16 %v2487_v1, %v2483_v34 }
 0x245   : > { %v2170_v5 = vpop.f32.mrb[20].mxu1  ;;  %v1170_v8 = vpack.c.bf16 %v2489_v2, %v2485_v0 }
 0x246   : > { %v1036_v6 = vadd.f32 %v2170_v5, %v3157_v43  ;;  %v1027_v7 = vpop.f32.mrb[21].mxu1 }
 0x247   : > { %v1028_v9 = vadd.f32 %v3157_v43, %v1027_v7  ;;  %v2171_v11 = vpop.f32.mrb[22].mxu1  ;;  %2204 = vmatprep.mubr.msk.bf16.mxu1 %vm1225_vm0, %v1170_v8 }
 0x248   : > { %2490 = vtanh.f32 %v1036_v6  ;;  %v1039_v12 = vadd.f32 %v2171_v11, %v3157_v43  ;;  %v1030_v13 = vpop.f32.mrb[23].mxu1  ;;  %2205 = vmatmul.mubr.msk.bf16.vlgmr.msra.gmra.mrb[48].mxu1 %vm1225_vm0, %v1171_v4 }
 0x249   : > { %2492 = vtanh.f32 %v1028_v9  ;;  %v1031_v14 = vadd.f32 %v3157_v43, %v1030_v13 }
 0x24a   : > { %2494 = vtanh.f32 %v1039_v12 }
 0x24b   : > { %2496 = vtanh.f32 %v1031_v14 }
 0x252   : > { %v2491_v16 = vpop.eup %2490 }
 0x253   : > { %v2493_v17 = vpop.eup %2492 }
 0x254   : > { %v2495_v18 = vpop.eup %2494  ;;  %v2174_v20 = vpop.f32.mrb[24].mxu1 }
 0x255   : > { %v2497_v56 = vpop.eup %2496  ;;  %v1173_v21 = vpack.c.bf16 %v2495_v18, %v2491_v16  ;;  %v1052_v22 = vadd.f32 %v2174_v20, %v3157_v43  ;;  %v1043_v24 = vpop.f32.mrb[25].mxu1 }
 0x256   : > { %v1172_v25 = vpack.c.bf16 %v2497_v56, %v2493_v17  ;;  %v1044_v26 = vadd.f32 %v3157_v43, %v1043_v24  ;;  %v2175_v27 = vpop.f32.mrb[26].mxu1 }
 0x257   : > { %2498 = vtanh.f32 %v1052_v22  ;;  %v1055_v30 = vadd.f32 %v2175_v27, %v3157_v43  ;;  %v1046_v31 = vpop.f32.mrb[27].mxu1 }
 0x258   : > { %2208 = vmatprep.mubr.msk.bf16.mxu1 %vm1225_vm0, %v1172_v25  ;;  %2500 = vtanh.f32 %v1044_v26  ;;  %v1047_v32 = vadd.f32 %v3157_v43, %v1046_v31 }
 0x259   : > { %2209 = vmatmul.mubr.msk.bf16.gmra.mrb[52].mxu1 %vm1225_vm0, %v1173_v21  ;;  %2502 = vtanh.f32 %v1055_v30 }
 0x25a   : > { %2504 = vtanh.f32 %v1047_v32 }
 0x261   : > { %v2499_v33 = vpop.eup %2498 }
 0x262   : > { %v2501_v36 = vpop.eup %2500 }
 0x263   : > { %v2503_v37 = vpop.eup %2502 }
 0x264   : > { %v2505_v38 = vpop.eup %2504  ;;  %v2178_v39 = vpop.f32.mrb[28].mxu1  ;;  %v1175_v40 = vpack.c.bf16 %v2503_v37, %v2499_v33 }
 0x265   : > { %v1068_v41 = vadd.f32 %v2178_v39, %v3157_v43  ;;  %v1059_v42 = vpop.f32.mrb[29].mxu1  ;;  %v1174_v44 = vpack.c.bf16 %v2505_v38, %v2501_v36 }
 0x266   : > { %v1060_v45 = vadd.f32 %v3157_v43, %v1059_v42  ;;  %v2179_v46 = vpop.f32.mrb[30].mxu1 }
 0x267   : > { %2506 = vtanh.f32 %v1068_v41  ;;  %v1071_v47 = vadd.f32 %v2179_v46, %v3157_v43  ;;  %v1062_v48 = vpop.f32.mrb[31].mxu1  ;;  %2212 = vmatprep.mubr.msk.bf16.mxu1 %vm1225_vm0, %v1174_v44 }
 0x268   : > { %2508 = vtanh.f32 %v1060_v45  ;;  %v1063_v49 = vadd.f32 %v3157_v43, %v1062_v48  ;;  %2213 = vmatmul.mubr.msk.bf16.gmra.mrb[56].mxu1 %vm1225_vm0, %v1175_v40  ;;  %v2417_v48 = vld [vmem:[%s3391_s7 + $0x8] sm:$0xff]  }
 0x269   : > { %2510 = vtanh.f32 %v1071_v47  ;;  %2238 = vmatprep.subr.bf16.mxu0 %v2417_v48 }
 0x26a   : > { %2512 = vtanh.f32 %v1063_v49  ;;  %2239 = vmatpush3.bf16.msra.mxu0 %v2417_v48  ;;  %v3213_v49 = vld [vmem:[%s3390_s6] ss:$0 sm:$0xff] }
 0x271   : > { %v2507_v51 = vpop.eup %2506 }
 0x272   : > { %v2509_v52 = vpop.eup %2508 }
 0x273   : > { %v2511_v53 = vpop.eup %2510 }
 0x274   : > { %v2513_v54 = vpop.eup %2512  ;;  %v2182_v55 = vpop.f32.mrb[32].mxu1  ;;  %v1177_v57 = vpack.c.bf16 %v2511_v53, %v2507_v51 }
 0x275   : > { %v1084_v60 = vadd.f32 %v2182_v55, %v3157_v43  ;;  %v1075_v61 = vpop.f32.mrb[33].mxu1  ;;  %v1176_v62 = vpack.c.bf16 %v2513_v54, %v2509_v52 }
 0x276   : > { %v1076_v58 = vadd.f32 %v3157_v43, %v1075_v61  ;;  %v2183_v63 = vpop.f32.mrb[34].mxu1 }
 0x277   : > { %2514 = vtanh.f32 %v1084_v60  ;;  %v1087_v28 = vadd.f32 %v2183_v63, %v3157_v43  ;;  %v1078_v35 = vpop.f32.mrb[35].mxu1  ;;  %2216 = vmatprep.mubr.msk.bf16.mxu1 %vm1225_vm0, %v1176_v62 }
 0x278   : > { %2516 = vtanh.f32 %v1076_v58  ;;  %v1079_v50 = vadd.f32 %v3157_v43, %v1078_v35  ;;  %2217 = vmatmul.mubr.msk.bf16.gmra.mrb[60].mxu1 %vm1225_vm0, %v1177_v57 }
 0x279   : > { %2518 = vtanh.f32 %v1087_v28 }
 0x27a   : > { %2520 = vtanh.f32 %v1079_v50 }
 0x281   : > { %v2515_v59 = vpop.eup %2514 }
 0x282   : > { %v2517_v3 = vpop.eup %2516 }
 0x283   : > { %v2519_v10 = vpop.eup %2518 }
 0x284   : > { %v2521_v15 = vpop.eup %2520  ;;  %v2186_v19 = vpop.f32.mrb[36].mxu1  ;;  %v1179_v23 = vpack.c.bf16 %v2519_v10, %v2515_v59 }
 0x285   : > { %v1100_v29 = vadd.f32 %v2186_v19, %v3157_v43  ;;  %v1091_v34 = vpop.f32.mrb[37].mxu1  ;;  %v1178_v0 = vpack.c.bf16 %v2521_v15, %v2517_v3 }
 0x286   : > { %v1092_v1 = vadd.f32 %v3157_v43, %v1091_v34  ;;  %v2187_v2 = vpop.f32.mrb[38].mxu1 }
 0x287   : > { %2522 = vtanh.f32 %v1100_v29  ;;  %v1103_v4 = vadd.f32 %v2187_v2, %v3157_v43  ;;  %v1094_v5 = vpop.f32.mrb[39].mxu1  ;;  %2220 = vmatprep.mubr.msk.bf16.mxu1 %vm1225_vm0, %v1178_v0 }
 0x288   : > { %2524 = vtanh.f32 %v1092_v1  ;;  %v1095_v6 = vadd.f32 %v3157_v43, %v1094_v5  ;;  %2221 = vmatmul.mubr.msk.bf16.gmra.mrb[64].mxu1 %vm1225_vm0, %v1179_v23 }
 0x289   : > { %2526 = vtanh.f32 %v1103_v4 }
 0x28a   : > { %2528 = vtanh.f32 %v1095_v6 }
 0x28c   : > { %v2190_v7 = vpop.f32.mrb[40].mxu1 }
 0x28d   : > { %v1116_v8 = vadd.f32 %v2190_v7, %v3157_v43  ;;  %v1107_v9 = vpop.f32.mrb[41].mxu1 }
 0x28e   : > { %v1108_v11 = vadd.f32 %v3157_v43, %v1107_v9  ;;  %v2191_v12 = vpop.f32.mrb[42].mxu1 }
 0x28f   : > { %2530 = vtanh.f32 %v1116_v8  ;;  %v1119_v13 = vadd.f32 %v2191_v12, %v3157_v43  ;;  %v1110_v14 = vpop.f32.mrb[43].mxu1 }
 0x290   : > { %2532 = vtanh.f32 %v1108_v11  ;;  %v1111_v16 = vadd.f32 %v3157_v43, %v1110_v14 }
 0x291   : > { %v2523_v17 = vpop.eup %2522  ;;  %2534 = vtanh.f32 %v1119_v13 }
 0x292   : > { %v2525_v18 = vpop.eup %2524  ;;  %2536 = vtanh.f32 %v1111_v16 }
 0x293   : > { %v2527_v56 = vpop.eup %2526 }
 0x294   : > { %v2529_v20 = vpop.eup %2528  ;;  %v2194_v21 = vpop.f32.mrb[44].mxu1  ;;  %v1181_v22 = vpack.c.bf16 %v2527_v56, %v2523_v17 }
 0x295   : > { %v1132_v24 = vadd.f32 %v2194_v21, %v3157_v43  ;;  %v1123_v25 = vpop.f32.mrb[45].mxu1  ;;  %v1180_v26 = vpack.c.bf16 %v2529_v20, %v2525_v18 }
 0x296   : > { %v1124_v27 = vadd.f32 %v3157_v43, %v1123_v25  ;;  %v2195_v30 = vpop.f32.mrb[46].mxu1 }
 0x297   : > { %2538 = vtanh.f32 %v1132_v24  ;;  %v1135_v31 = vadd.f32 %v2195_v30, %v3157_v43  ;;  %v1126_v32 = vpop.f32.mrb[47].mxu1  ;;  %2224 = vmatprep.mubr.msk.bf16.mxu1 %vm1225_vm0, %v1180_v26 }
 0x298   : > { %2540 = vtanh.f32 %v1124_v27  ;;  %v1127_v33 = vadd.f32 %v3157_v43, %v1126_v32  ;;  %2225 = vmatmul.mubr.msk.bf16.gmra.mrb[68].mxu1 %vm1225_vm0, %v1181_v22 }
 0x299   : > { %v2531_v36 = vpop.eup %2530  ;;  %2542 = vtanh.f32 %v1135_v31 }
 0x29a   : > { %v2533_v37 = vpop.eup %2532  ;;  %2544 = vtanh.f32 %v1127_v33 }
 0x29b   : > { %v2535_v38 = vpop.eup %2534 }
 0x29c   : > { %v2537_v39 = vpop.eup %2536  ;;  %v1183_v40 = vpack.c.bf16 %v2535_v38, %v2531_v36 }
 0x29d   : > { %v1182_v41 = vpack.c.bf16 %v2537_v39, %v2533_v37 }
 0x29f   : > { %2228 = vmatprep.mubr.msk.bf16.mxu1 %vm1225_vm0, %v1182_v41 }
 0x2a0   : > { %2229 = vmatmul.mubr.msk.bf16.gmra.mrb[72].mxu1 %vm1225_vm0, %v1183_v40 }
 0x2a1   : > { %v2539_v42 = vpop.eup %2538 }
 0x2a2   : > { %v2541_v44 = vpop.eup %2540 }
 0x2a3   : > { %v2543_v45 = vpop.eup %2542 }
 0x2a4   : > { %v2545_v46 = vpop.eup %2544  ;;  %v1185_v47 = vpack.c.bf16 %v2543_v45, %v2539_v42 }
 0x2a5   : > { %v1184_v43 = vpack.c.bf16 %v2545_v46, %v2541_v44 }
 0x2a7   : > { %2232 = vmatprep.mubr.msk.bf16.mxu1 %vm1225_vm0, %v1184_v43 }
 0x2a8   : > { %2233 = vmatmul.mubr.msk.bf16.gmra.mrb[76].mxu1 %vm1225_vm0, %v1185_v47 }
 0x31b   : > { %v2206_v51 = vpop.f32.mrb[48].mxu1 }
 0x31c   : > { %v1317_v52 = vadd.f32 %v2206_v51, %v3213_v49  ;;  %v1308_v53 = vpop.f32.mrb[49].mxu1 }
 0x31d   : > { %v1309_v54 = vadd.f32 %v3213_v49, %v1308_v53  ;;  %v2207_v55 = vpop.f32.mrb[50].mxu1 }
 0x31e   : > { %2546 = vtanh.f32 %v1317_v52  ;;  %v1320_v57 = vadd.f32 %v2207_v55, %v3213_v49  ;;  %v1311_v60 = vpop.f32.mrb[51].mxu1 }
 0x31f   : > { %2548 = vtanh.f32 %v1309_v54  ;;  %v1312_v61 = vadd.f32 %v3213_v49, %v1311_v60 }
 0x320   : > { %2550 = vtanh.f32 %v1320_v57 }
 0x321   : > { %2552 = vtanh.f32 %v1312_v61 }
 0x328   : > { %v2547_v62 = vpop.eup %2546 }
 0x329   : > { %v2549_v58 = vpop.eup %2548 }
 0x32a   : > { %v2551_v63 = vpop.eup %2550 }
 0x32b   : > { %v2553_v28 = vpop.eup %2552  ;;  %v1468_v35 = vpack.c.bf16 %v2551_v63, %v2547_v62 }
 0x32c   : > { %v2210_v50 = vpop.f32.mrb[52].mxu1  ;;  %v1467_v10 = vpack.c.bf16 %v2553_v28, %v2549_v58 }
 0x32d   : > { %v1333_v59 = vadd.f32 %v2210_v50, %v3213_v49  ;;  %v1324_v3 = vpop.f32.mrb[53].mxu1 }
 0x32e   : > { %v1325_v15 = vadd.f32 %v3213_v49, %v1324_v3  ;;  %v2211_v19 = vpop.f32.mrb[54].mxu1  ;;  %2240 = vmatprep.mubr.msk.bf16.mxu0 %vm1506_vm1, %v1467_v10 }
 0x32f   : > { %2554 = vtanh.f32 %v1333_v59  ;;  %v1336_v23 = vadd.f32 %v2211_v19, %v3213_v49  ;;  %v1327_v29 = vpop.f32.mrb[55].mxu1  ;;  %2241 = vmatmul.mubr.msk.bf16.vlgmr.msra.gmra.mrb[48].mxu0 %vm1506_vm1, %v1468_v35 }
 0x330   : > { %2556 = vtanh.f32 %v1325_v15  ;;  %v1328_v34 = vadd.f32 %v3213_v49, %v1327_v29 }
 0x331   : > { %2558 = vtanh.f32 %v1336_v23 }
 0x332   : > { %2560 = vtanh.f32 %v1328_v34 }
 0x339   : > { %v2555_v0 = vpop.eup %2554 }
 0x33a   : > { %v2557_v1 = vpop.eup %2556 }
 0x33b   : > { %v2559_v2 = vpop.eup %2558  ;;  %v2214_v5 = vpop.f32.mrb[56].mxu1 }
 0x33c   : > { %v2561_v4 = vpop.eup %2560  ;;  %v1470_v6 = vpack.c.bf16 %v2559_v2, %v2555_v0  ;;  %v1349_v7 = vadd.f32 %v2214_v5, %v3213_v49  ;;  %v1340_v8 = vpop.f32.mrb[57].mxu1 }
 0x33d   : > { %v1469_v9 = vpack.c.bf16 %v2561_v4, %v2557_v1  ;;  %v1341_v11 = vadd.f32 %v3213_v49, %v1340_v8  ;;  %v2215_v12 = vpop.f32.mrb[58].mxu1 }
 0x33e   : > { %2562 = vtanh.f32 %v1349_v7  ;;  %v1352_v13 = vadd.f32 %v2215_v12, %v3213_v49  ;;  %v1343_v14 = vpop.f32.mrb[59].mxu1 }
 0x33f   : > { %2244 = vmatprep.mubr.msk.bf16.mxu0 %vm1506_vm1, %v1469_v9  ;;  %2564 = vtanh.f32 %v1341_v11  ;;  %v1344_v16 = vadd.f32 %v3213_v49, %v1343_v14 }
 0x340   : > { %2245 = vmatmul.mubr.msk.bf16.gmra.mrb[52].mxu0 %vm1506_vm1, %v1470_v6  ;;  %2566 = vtanh.f32 %v1352_v13 }
 0x341   : > { %2568 = vtanh.f32 %v1344_v16 }
 0x348   : > { %v2563_v17 = vpop.eup %2562 }
 0x349   : > { %v2565_v18 = vpop.eup %2564 }
 0x34a   : > { %v2567_v56 = vpop.eup %2566 }
 0x34b   : > { %v2569_v20 = vpop.eup %2568  ;;  %v2218_v21 = vpop.f32.mrb[60].mxu1  ;;  %v1472_v22 = vpack.c.bf16 %v2567_v56, %v2563_v17 }
 0x34c   : > { %v1365_v24 = vadd.f32 %v2218_v21, %v3213_v49  ;;  %v1356_v25 = vpop.f32.mrb[61].mxu1  ;;  %v1471_v26 = vpack.c.bf16 %v2569_v20, %v2565_v18 }
 0x34d   : > { %v1357_v27 = vadd.f32 %v3213_v49, %v1356_v25  ;;  %v2219_v30 = vpop.f32.mrb[62].mxu1 }
 0x34e   : > { %2570 = vtanh.f32 %v1365_v24  ;;  %v1368_v31 = vadd.f32 %v2219_v30, %v3213_v49  ;;  %v1359_v32 = vpop.f32.mrb[63].mxu1  ;;  %2248 = vmatprep.mubr.msk.bf16.mxu0 %vm1506_vm1, %v1471_v26 }
 0x34f   : > { %2572 = vtanh.f32 %v1357_v27  ;;  %v1360_v33 = vadd.f32 %v3213_v49, %v1359_v32  ;;  %2249 = vmatmul.mubr.msk.bf16.gmra.mrb[56].mxu0 %vm1506_vm1, %v1472_v22  ;;  %v3268_v32 = vld [vmem:[%s3392_s8] ss:$0 sm:$0xff] }
 0x350   : > { %2574 = vtanh.f32 %v1368_v31 }
 0x351   : > { %2576 = vtanh.f32 %v1360_v33 }
 0x358   : > { %v2571_v36 = vpop.eup %2570 }
 0x359   : > { %v2573_v37 = vpop.eup %2572 }
 0x35a   : > { %v2575_v38 = vpop.eup %2574 }
 0x35b   : > { %v2577_v39 = vpop.eup %2576  ;;  %v2222_v40 = vpop.f32.mrb[64].mxu1  ;;  %v1474_v41 = vpack.c.bf16 %v2575_v38, %v2571_v36 }
 0x35c   : > { %v1381_v42 = vadd.f32 %v2222_v40, %v3213_v49  ;;  %v1372_v44 = vpop.f32.mrb[65].mxu1  ;;  %v1473_v45 = vpack.c.bf16 %v2577_v39, %v2573_v37 }
 0x35d   : > { %v1373_v46 = vadd.f32 %v3213_v49, %v1372_v44  ;;  %v2223_v47 = vpop.f32.mrb[66].mxu1 }
 0x35e   : > { %2578 = vtanh.f32 %v1381_v42  ;;  %v1384_v43 = vadd.f32 %v2223_v47, %v3213_v49  ;;  %v1375_v48 = vpop.f32.mrb[67].mxu1  ;;  %2252 = vmatprep.mubr.msk.bf16.mxu0 %vm1506_vm1, %v1473_v45 }
 0x35f   : > { %2580 = vtanh.f32 %v1373_v46  ;;  %v1376_v51 = vadd.f32 %v3213_v49, %v1375_v48  ;;  %2253 = vmatmul.mubr.msk.bf16.gmra.mrb[60].mxu0 %vm1506_vm1, %v1474_v41 }
 0x360   : > { %2582 = vtanh.f32 %v1384_v43 }
 0x361   : > { %2584 = vtanh.f32 %v1376_v51 }
 0x368   : > { %v2579_v52 = vpop.eup %2578 }
 0x369   : > { %v2581_v53 = vpop.eup %2580 }
 0x36a   : > { %v2583_v54 = vpop.eup %2582 }
 0x36b   : > { %v2585_v55 = vpop.eup %2584  ;;  %v2226_v57 = vpop.f32.mrb[68].mxu1  ;;  %v1476_v60 = vpack.c.bf16 %v2583_v54, %v2579_v52 }
 0x36c   : > { %v1397_v61 = vadd.f32 %v2226_v57, %v3213_v49  ;;  %v1388_v62 = vpop.f32.mrb[69].mxu1  ;;  %v1475_v58 = vpack.c.bf16 %v2585_v55, %v2581_v53 }
 0x36d   : > { %v1389_v63 = vadd.f32 %v3213_v49, %v1388_v62  ;;  %v2227_v28 = vpop.f32.mrb[70].mxu1 }
 0x36e   : > { %2586 = vtanh.f32 %v1397_v61  ;;  %v1400_v35 = vadd.f32 %v2227_v28, %v3213_v49  ;;  %v1391_v50 = vpop.f32.mrb[71].mxu1  ;;  %2256 = vmatprep.mubr.msk.bf16.mxu0 %vm1506_vm1, %v1475_v58 }
 0x36f   : > { %2588 = vtanh.f32 %v1389_v63  ;;  %v1392_v59 = vadd.f32 %v3213_v49, %v1391_v50  ;;  %2257 = vmatmul.mubr.msk.bf16.gmra.mrb[64].mxu0 %vm1506_vm1, %v1476_v60 }
 0x370   : > { %2590 = vtanh.f32 %v1400_v35 }
 0x371   : > { %2592 = vtanh.f32 %v1392_v59 }
 0x373   : > { %v2230_v3 = vpop.f32.mrb[72].mxu1 }
 0x374   : > { %v1413_v10 = vadd.f32 %v2230_v3, %v3213_v49  ;;  %v1404_v15 = vpop.f32.mrb[73].mxu1 }
 0x375   : > { %v1405_v19 = vadd.f32 %v3213_v49, %v1404_v15  ;;  %v2231_v23 = vpop.f32.mrb[74].mxu1 }
 0x376   : > { %2594 = vtanh.f32 %v1413_v10  ;;  %v1416_v29 = vadd.f32 %v2231_v23, %v3213_v49  ;;  %v1407_v34 = vpop.f32.mrb[75].mxu1 }
 0x377   : > { %2596 = vtanh.f32 %v1405_v19  ;;  %v1408_v0 = vadd.f32 %v3213_v49, %v1407_v34 }
 0x378   : > { %v2587_v1 = vpop.eup %2586  ;;  %2598 = vtanh.f32 %v1416_v29 }
 0x379   : > { %v2589_v2 = vpop.eup %2588  ;;  %2600 = vtanh.f32 %v1408_v0 }
 0x37a   : > { %v2591_v4 = vpop.eup %2590 }
 0x37b   : > { %v2593_v5 = vpop.eup %2592  ;;  %v2234_v6 = vpop.f32.mrb[76].mxu1  ;;  %v1478_v7 = vpack.c.bf16 %v2591_v4, %v2587_v1 }
 0x37c   : > { %v1429_v8 = vadd.f32 %v2234_v6, %v3213_v49  ;;  %v1420_v9 = vpop.f32.mrb[77].mxu1  ;;  %v1477_v11 = vpack.c.bf16 %v2593_v5, %v2589_v2 }
 0x37d   : > { %v1421_v12 = vadd.f32 %v3213_v49, %v1420_v9  ;;  %v2235_v13 = vpop.f32.mrb[78].mxu1 }
 0x37e   : > { %2602 = vtanh.f32 %v1429_v8  ;;  %v1432_v14 = vadd.f32 %v2235_v13, %v3213_v49  ;;  %v1423_v16 = vpop.f32.mrb[79].mxu1  ;;  %2260 = vmatprep.mubr.msk.bf16.mxu0 %vm1506_vm1, %v1477_v11 }
 0x37f   : > { %2604 = vtanh.f32 %v1421_v12  ;;  %v1424_v17 = vadd.f32 %v3213_v49, %v1423_v16  ;;  %2261 = vmatmul.mubr.msk.bf16.gmra.mrb[68].mxu0 %vm1506_vm1, %v1478_v7 }
 0x380   : > { %v2595_v18 = vpop.eup %2594  ;;  %2606 = vtanh.f32 %v1432_v14 }
 0x381   : > { %v2597_v56 = vpop.eup %2596  ;;  %2608 = vtanh.f32 %v1424_v17 }
 0x382   : > { %v2599_v20 = vpop.eup %2598 }
 0x383   : > { %v2601_v21 = vpop.eup %2600  ;;  %v1480_v22 = vpack.c.bf16 %v2599_v20, %v2595_v18 }
 0x384   : > { %v1479_v24 = vpack.c.bf16 %v2601_v21, %v2597_v56 }
 0x386   : > { %2264 = vmatprep.mubr.msk.bf16.mxu0 %vm1506_vm1, %v1479_v24 }
 0x387   : > { %2265 = vmatmul.mubr.msk.bf16.gmra.mrb[72].mxu0 %vm1506_vm1, %v1480_v22 }
 0x388   : > { %v2603_v25 = vpop.eup %2602 }
 0x389   : > { %v2605_v26 = vpop.eup %2604 }
 0x38a   : > { %v2607_v27 = vpop.eup %2606 }
 0x38b   : > { %v2609_v30 = vpop.eup %2608  ;;  %v1482_v49 = vpack.c.bf16 %v2607_v27, %v2603_v25 }
 0x38c   : > { %v1481_v31 = vpack.c.bf16 %v2609_v30, %v2605_v26 }
 0x38e   : > { %2268 = vmatprep.mubr.msk.bf16.mxu0 %vm1506_vm1, %v1481_v31 }
 0x38f   : > { %2269 = vmatmul.mubr.msk.bf16.gmra.mrb[76].mxu0 %vm1506_vm1, %v1482_v49 }
 0x402   : > { %v2242_v33 = vpop.f32.mrb[48].mxu0 }
 0x403   : > { %v1598_v36 = vadd.f32 %v2242_v33, %v3268_v32  ;;  %v1589_v37 = vpop.f32.mrb[49].mxu0 }
 0x404   : > { %v1590_v38 = vadd.f32 %v3268_v32, %v1589_v37  ;;  %v2243_v39 = vpop.f32.mrb[50].mxu0 }
 0x405   : > { %2610 = vtanh.f32 %v1598_v36  ;;  %v1601_v40 = vadd.f32 %v2243_v39, %v3268_v32  ;;  %v1592_v41 = vpop.f32.mrb[51].mxu0 }
 0x406   : > { %2612 = vtanh.f32 %v1590_v38  ;;  %v1593_v42 = vadd.f32 %v3268_v32, %v1592_v41 }
 0x407   : > { %2614 = vtanh.f32 %v1601_v40 }
 0x408   : > { %2616 = vtanh.f32 %v1593_v42 }
 0x40f   : > { %v2611_v44 = vpop.eup %2610 }
 0x410   : > { %v2613_v45 = vpop.eup %2612  ;;  %1751 = vst.msk [vmem:[%s3277_s19 + $0x10] sm:$0xff] %vm1748_vm2, %v2611_v44 }
 0x411   : > { %v2615_v46 = vpop.eup %2614  ;;  %1749 = vst.msk [vmem:[%s3277_s19] sm:$0xff] %vm1748_vm2, %v2613_v45 }
 0x412   : > { %v2617_v47 = vpop.eup %2616  ;;  %1752 = vst.msk [vmem:[%s3277_s19 + $0x18] sm:$0xff] %vm1748_vm2, %v2615_v46 }
 0x413   : > { %v2246_v43 = vpop.f32.mrb[52].mxu0  ;;  %1750 = vst.msk [vmem:[%s3277_s19 + $0x8] sm:$0xff] %vm1748_vm2, %v2617_v47 }
 0x414   : > { %v1614_v48 = vadd.f32 %v2246_v43, %v3268_v32  ;;  %v1605_v51 = vpop.f32.mrb[53].mxu0 }
 0x415   : > { %v1606_v52 = vadd.f32 %v3268_v32, %v1605_v51  ;;  %v2247_v53 = vpop.f32.mrb[54].mxu0 }
 0x416   : > { %2618 = vtanh.f32 %v1614_v48  ;;  %v1617_v54 = vadd.f32 %v2247_v53, %v3268_v32  ;;  %v1608_v55 = vpop.f32.mrb[55].mxu0 }
 0x417   : > { %2620 = vtanh.f32 %v1606_v52  ;;  %v1609_v57 = vadd.f32 %v3268_v32, %v1608_v55 }
 0x418   : > { %2622 = vtanh.f32 %v1617_v54 }
 0x419   : > { %2624 = vtanh.f32 %v1609_v57 }
 0x420   : > { %v2619_v60 = vpop.eup %2618 }
 0x421   : > { %v2621_v61 = vpop.eup %2620  ;;  %1755 = vst.msk [vmem:[%s3277_s19 + $0x30] sm:$0xff] %vm1748_vm2, %v2619_v60 }
 0x422   : > { %v2623_v62 = vpop.eup %2622  ;;  %1753 = vst.msk [vmem:[%s3277_s19 + $0x20] sm:$0xff] %vm1748_vm2, %v2621_v61  ;;  %v2250_v63 = vpop.f32.mrb[56].mxu0 }
 0x423   : > { %v2625_v58 = vpop.eup %2624  ;;  %1756 = vst.msk [vmem:[%s3277_s19 + $0x38] sm:$0xff] %vm1748_vm2, %v2623_v62  ;;  %v1630_v28 = vadd.f32 %v2250_v63, %v3268_v32  ;;  %v1621_v35 = vpop.f32.mrb[57].mxu0 }
 0x424   : > { %1754 = vst.msk [vmem:[%s3277_s19 + $0x28] sm:$0xff] %vm1748_vm2, %v2625_v58  ;;  %v1622_v50 = vadd.f32 %v3268_v32, %v1621_v35  ;;  %v2251_v59 = vpop.f32.mrb[58].mxu0 }
 0x425   : > { %2626 = vtanh.f32 %v1630_v28  ;;  %v1633_v3 = vadd.f32 %v2251_v59, %v3268_v32  ;;  %v1624_v10 = vpop.f32.mrb[59].mxu0 }
 0x426   : > { %2628 = vtanh.f32 %v1622_v50  ;;  %v1625_v15 = vadd.f32 %v3268_v32, %v1624_v10 }
 0x427   : > { %2630 = vtanh.f32 %v1633_v3 }
 0x428   : > { %2632 = vtanh.f32 %v1625_v15 }
 0x42f   : > { %v2627_v19 = vpop.eup %2626 }
 0x430   : > { %v2629_v23 = vpop.eup %2628  ;;  %1759 = vst.msk [vmem:[%s3277_s19 + $0x50] sm:$0xff] %vm1748_vm2, %v2627_v19 }
 0x431   : > { %v2631_v29 = vpop.eup %2630  ;;  %1757 = vst.msk [vmem:[%s3277_s19 + $0x40] sm:$0xff] %vm1748_vm2, %v2629_v23 }
 0x432   : > { %v2633_v34 = vpop.eup %2632  ;;  %1760 = vst.msk [vmem:[%s3277_s19 + $0x58] sm:$0xff] %vm1748_vm2, %v2631_v29  ;;  %v2254_v0 = vpop.f32.mrb[60].mxu0 }
 0x433   : > { %1758 = vst.msk [vmem:[%s3277_s19 + $0x48] sm:$0xff] %vm1748_vm2, %v2633_v34  ;;  %v1646_v1 = vadd.f32 %v2254_v0, %v3268_v32  ;;  %v1637_v2 = vpop.f32.mrb[61].mxu0 }
 0x434   : > { %v1638_v4 = vadd.f32 %v3268_v32, %v1637_v2  ;;  %v2255_v5 = vpop.f32.mrb[62].mxu0 }
 0x435   : > { %2634 = vtanh.f32 %v1646_v1  ;;  %v1649_v6 = vadd.f32 %v2255_v5, %v3268_v32  ;;  %v1640_v7 = vpop.f32.mrb[63].mxu0 }
 0x436   : > { %2636 = vtanh.f32 %v1638_v4  ;;  %v1641_v8 = vadd.f32 %v3268_v32, %v1640_v7 }
 0x437   : > { %2638 = vtanh.f32 %v1649_v6 }
 0x438   : > { %2640 = vtanh.f32 %v1641_v8 }
 0x43f   : > { %v2635_v9 = vpop.eup %2634 }
 0x440   : > { %v2637_v11 = vpop.eup %2636  ;;  %1763 = vst.msk [vmem:[%s3277_s19 + $0x70] sm:$0xff] %vm1748_vm2, %v2635_v9 }
 0x441   : > { %v2639_v12 = vpop.eup %2638  ;;  %1761 = vst.msk [vmem:[%s3277_s19 + $0x60] sm:$0xff] %vm1748_vm2, %v2637_v11 }
 0x442   : > { %v2641_v13 = vpop.eup %2640  ;;  %1764 = vst.msk [vmem:[%s3277_s19 + $0x78] sm:$0xff] %vm1748_vm2, %v2639_v12  ;;  %v2258_v14 = vpop.f32.mrb[64].mxu0 }
 0x443   : > { %1762 = vst.msk [vmem:[%s3277_s19 + $0x68] sm:$0xff] %vm1748_vm2, %v2641_v13  ;;  %v1662_v16 = vadd.f32 %v2258_v14, %v3268_v32  ;;  %v1653_v17 = vpop.f32.mrb[65].mxu0 }
 0x444   : > { %v1654_v18 = vadd.f32 %v3268_v32, %v1653_v17  ;;  %v2259_v56 = vpop.f32.mrb[66].mxu0 }
 0x445   : > { %2642 = vtanh.f32 %v1662_v16  ;;  %v1665_v20 = vadd.f32 %v2259_v56, %v3268_v32  ;;  %v1656_v21 = vpop.f32.mrb[67].mxu0 }
 0x446   : > { %2644 = vtanh.f32 %v1654_v18  ;;  %v1657_v22 = vadd.f32 %v3268_v32, %v1656_v21 }
 0x447   : > { %2646 = vtanh.f32 %v1665_v20 }
 0x448   : > { %2648 = vtanh.f32 %v1657_v22 }
 0x44f   : > { %v2643_v24 = vpop.eup %2642 }
 0x450   : > { %v2645_v25 = vpop.eup %2644  ;;  %1767 = vst.msk [vmem:[%s3277_s19 + $0x90] sm:$0xff] %vm1748_vm2, %v2643_v24 }
 0x451   : > { %v2647_v26 = vpop.eup %2646  ;;  %1765 = vst.msk [vmem:[%s3277_s19 + $0x80] sm:$0xff] %vm1748_vm2, %v2645_v25 }
 0x452   : > { %v2649_v27 = vpop.eup %2648  ;;  %1768 = vst.msk [vmem:[%s3277_s19 + $0x98] sm:$0xff] %vm1748_vm2, %v2647_v26  ;;  %v2262_v30 = vpop.f32.mrb[68].mxu0 }
 0x453   : > { %1766 = vst.msk [vmem:[%s3277_s19 + $0x88] sm:$0xff] %vm1748_vm2, %v2649_v27  ;;  %v1678_v49 = vadd.f32 %v2262_v30, %v3268_v32  ;;  %v1669_v31 = vpop.f32.mrb[69].mxu0 }
 0x454   : > { %v1670_v33 = vadd.f32 %v3268_v32, %v1669_v31  ;;  %v2263_v36 = vpop.f32.mrb[70].mxu0 }
 0x455   : > { %2650 = vtanh.f32 %v1678_v49  ;;  %v1681_v37 = vadd.f32 %v2263_v36, %v3268_v32  ;;  %v1672_v38 = vpop.f32.mrb[71].mxu0 }
 0x456   : > { %2652 = vtanh.f32 %v1670_v33  ;;  %v1673_v39 = vadd.f32 %v3268_v32, %v1672_v38 }
 0x457   : > { %2654 = vtanh.f32 %v1681_v37 }
 0x458   : > { %2656 = vtanh.f32 %v1673_v39 }
 0x45a   : > { %v2266_v40 = vpop.f32.mrb[72].mxu0 }
 0x45b   : > { %v1694_v41 = vadd.f32 %v2266_v40, %v3268_v32  ;;  %v1685_v42 = vpop.f32.mrb[73].mxu0 }
 0x45c   : > { %v1686_v44 = vadd.f32 %v3268_v32, %v1685_v42  ;;  %v2267_v45 = vpop.f32.mrb[74].mxu0 }
 0x45d   : > { %2658 = vtanh.f32 %v1694_v41  ;;  %v1697_v46 = vadd.f32 %v2267_v45, %v3268_v32  ;;  %v1688_v47 = vpop.f32.mrb[75].mxu0 }
 0x45e   : > { %2660 = vtanh.f32 %v1686_v44  ;;  %v1689_v43 = vadd.f32 %v3268_v32, %v1688_v47 }
 0x45f   : > { %v2651_v48 = vpop.eup %2650  ;;  %2662 = vtanh.f32 %v1697_v46 }
 0x460   : > { %v2653_v51 = vpop.eup %2652  ;;  %1771 = vst.msk [vmem:[%s3277_s19 + $0xb0] sm:$0xff] %vm1748_vm2, %v2651_v48  ;;  %2664 = vtanh.f32 %v1689_v43 }
 0x461   : > { %v2655_v52 = vpop.eup %2654  ;;  %1769 = vst.msk [vmem:[%s3277_s19 + $0xa0] sm:$0xff] %vm1748_vm2, %v2653_v51 }
 0x462   : > { %v2657_v53 = vpop.eup %2656  ;;  %1772 = vst.msk [vmem:[%s3277_s19 + $0xb8] sm:$0xff] %vm1748_vm2, %v2655_v52  ;;  %v2270_v54 = vpop.f32.mrb[76].mxu0 }
 0x463   : > { %1770 = vst.msk [vmem:[%s3277_s19 + $0xa8] sm:$0xff] %vm1748_vm2, %v2657_v53  ;;  %v1710_v55 = vadd.f32 %v2270_v54, %v3268_v32  ;;  %v1701_v57 = vpop.f32.mrb[77].mxu0 }
 0x464   : > { %v1702_v60 = vadd.f32 %v3268_v32, %v1701_v57  ;;  %v2271_v61 = vpop.f32.mrb[78].mxu0 }
 0x465   : > { %2666 = vtanh.f32 %v1710_v55  ;;  %v1713_v62 = vadd.f32 %v2271_v61, %v3268_v32  ;;  %v1704_v58 = vpop.f32.mrb[79].mxu0 }
 0x466   : > { %2668 = vtanh.f32 %v1702_v60  ;;  %v1705_v63 = vadd.f32 %v3268_v32, %v1704_v58 }
 0x467   : > { %v2659_v28 = vpop.eup %2658  ;;  %2670 = vtanh.f32 %v1713_v62 }
 0x468   : > { %v2661_v35 = vpop.eup %2660  ;;  %1775 = vst.msk [vmem:[%s3277_s19 + $0xd0] sm:$0xff] %vm1748_vm2, %v2659_v28  ;;  %2672 = vtanh.f32 %v1705_v63 }
 0x469   : > { %v2663_v50 = vpop.eup %2662  ;;  %1773 = vst.msk [vmem:[%s3277_s19 + $0xc0] sm:$0xff] %vm1748_vm2, %v2661_v35 }
 0x46a   : > { %v2665_v59 = vpop.eup %2664  ;;  %1776 = vst.msk [vmem:[%s3277_s19 + $0xd8] sm:$0xff] %vm1748_vm2, %v2663_v50 }
 0x46b   : > { %1774 = vst.msk [vmem:[%s3277_s19 + $0xc8] sm:$0xff] %vm1748_vm2, %v2665_v59 }
 0x46f   : > { %v2667_v3 = vpop.eup %2666 }
 0x470   : > { %v2669_v10 = vpop.eup %2668  ;;  %1779 = vst.msk [vmem:[%s3277_s19 + $0xf0] sm:$0xff] %vm1748_vm2, %v2667_v3 }
 0x471   : > { %v2671_v32 = vpop.eup %2670  ;;  %1777 = vst.msk [vmem:[%s3277_s19 + $0xe0] sm:$0xff] %vm1748_vm2, %v2669_v10 }
 0x472   : > { %v2673_v15 = vpop.eup %2672  ;;  %1780 = vst.msk [vmem:[%s3277_s19 + $0xf8] sm:$0xff] %vm1748_vm2, %v2671_v32 }
 0x473   : > { %1778 = vst.msk [vmem:[%s3277_s19 + $0xe8] sm:$0xff] %vm1748_vm2, %v2673_v15 }
 0x474 PF: > { %p20_p3 = scmp.ge.s32.totalorder %s2846_s14, 4   ;;  %s3411_s30 = smov %s2762_s10 }
 0x475   : > { %s3412_s10 = smov %s2766_s11  ;;  %s3413_s11 = smov %s2856_s17 }
 0x476   : > { %s3414_s12 = smov %s2846_s14  ;;  %22 = sbr.rel (!%p20_p3) target bundleno = 4 (0x4), region = 100 }
 0x47d   :  { %1803 = vsyncpa [#allocation3], 1 }
 0x47e   :  { %1805 = vsyncpa [#allocation3 + $0x1], 1 }
 0x47f   :  { %1806 = vsyncpa [#allocation5], 1 }

</bundles_post_ra>
